<compile_context>
chip_gen: v5e
topology: v5e:2x2
jax: 0.10.0
libtpu: 0.0.40
codegen_flags: <defaults>
</compile_context>

<pallas_src>
import functools

import jax
import jax.numpy as jnp
import numpy as np
from jax import lax
from jax.experimental import pallas as pl
from jax.experimental.pallas import tpu as pltpu

EPS = 1e-5  # nn.LayerNorm default eps


def _layernorm(x, gamma, beta):
    mean = jnp.mean(x, axis=-1, keepdims=True)
    var = jnp.mean((x - mean) ** 2, axis=-1, keepdims=True)  # biased, like PyTorch
    return (x - mean) * lax.rsqrt(var + EPS) * gamma + beta


def _gelu_exact(x):
    # PyTorch nn.GELU() default: exact erf formulation (kept for parity).
    return 0.5 * x * (1.0 + lax.erf(x * np.float32(1.0 / np.sqrt(2.0))))


def transformer_block_kernel(num_heads, batch_block, seq_len,
                             x_ref, g1_ref, b1_ref, wqkv_ref, wp_ref, bp_ref,
                             g2_ref, b2_ref, w1_ref, bm1_ref, w2_ref, bm2_ref,
                             o_ref):
    x = x_ref[...]                              # (M, C) f32, M = batch_block * seq_len
    M, C = x.shape
    D = C // num_heads

    # ---- attention branch: x + proj(attn(norm1(x))) ----
    h = _layernorm(x, g1_ref[...], b1_ref[...])
    # single lane-dense C-contraction matmul for all of Q/K/V (Q columns pre-scaled)
    qkv = jnp.dot(h.astype(jnp.bfloat16), wqkv_ref[...],
                  preferred_element_type=jnp.float32)          # (M, 3C) f32

    # head merge folded into the projection: accumulate per-head contributions.
    attn_out = jnp.broadcast_to(bp_ref[...], (M, C)).astype(jnp.float32)
    for hi in range(num_heads):
        o0 = hi * D
        q = qkv[:, o0:o0 + D].astype(jnp.bfloat16).reshape(batch_block, seq_len, D)
        k = qkv[:, C + o0:C + o0 + D].astype(jnp.bfloat16).reshape(batch_block, seq_len, D)
        v = qkv[:, 2 * C + o0:2 * C + o0 + D].astype(jnp.bfloat16).reshape(batch_block, seq_len, D)

        # batched over the (sub-)batch axis only -- no explicit transpose of K
        s = jnp.einsum('bqd,bkd->bqk', q, k,
                       preferred_element_type=jnp.float32)     # (Bb, N, N) f32
        s = s - jnp.max(s, axis=-1, keepdims=True)
        p = jnp.exp(s)
        p = p * pl.reciprocal(jnp.sum(p, axis=-1, keepdims=True), approx=True)
        ho = jnp.einsum('bqk,bkd->bqd', p.astype(jnp.bfloat16), v,
                        preferred_element_type=jnp.float32)    # (Bb, N, D) f32

        attn_out = attn_out + jnp.dot(ho.reshape(M, D).astype(jnp.bfloat16),
                                      wp_ref[hi],
                                      preferred_element_type=jnp.float32)
    x = x + attn_out

    # ---- MLP branch: x + W2(gelu(W1(norm2(x)))) ----
    h2 = _layernorm(x, g2_ref[...], b2_ref[...])
    m = jnp.dot(h2.astype(jnp.bfloat16), w1_ref[...],
                preferred_element_type=jnp.float32) + bm1_ref[...]
    m = _gelu_exact(m)
    m = jnp.dot(m.astype(jnp.bfloat16), w2_ref[...],
                preferred_element_type=jnp.float32) + bm2_ref[...]
    o_ref[...] = (x + m).astype(o_ref.dtype)


def _vmem_limit_bytes():
    """Per-generation scoped VMEM limit: cap - 16MiB headroom, clamped [32, 100] MiB."""
    default = 48 << 20
    try:
        cap = int(getattr(pltpu.get_tpu_info(), "vmem_capacity_bytes", 0))
    except Exception:
        return default
    if cap <= 0:
        return default
    return int(min(100 << 20, max(32 << 20, cap - (16 << 20))))


def _pick_batch_block(batch):
    """Merge as many batches per grid step as possible while keeping >= 2 grid
    steps (v7x megacore) whenever there are >= 2 batches."""
    if batch <= 1:
        return 1
    for bb in range(batch // 2, 0, -1):
        if batch % bb == 0:
            return bb
    return 1


def transformer_block(x, params, num_heads, batch_block=None):
    B, N, C = x.shape
    Hd = params["w1"].shape[1]
    assert C % num_heads == 0
    head_dim = C // num_heads
    scale = float(head_dim) ** -0.5

    if batch_block is None:
        batch_block = _pick_batch_block(B)
    assert B % batch_block == 0
    nb = B // batch_block
    M = batch_block * N

    # bf16 weights: halve HBM->VMEM traffic + native MXU dtype on v6e/v7x.
    # 1/sqrt(head_dim) folded into the Q columns; proj weight pre-reshaped to
    # (H, head_dim, C) so the kernel can accumulate per-head projections.
    wqkv = params["wqkv"]
    wqkv = jnp.concatenate([wqkv[:, :C] * scale, wqkv[:, C:]],
                           axis=1).astype(jnp.bfloat16)
    wp = params["wp"].reshape(num_heads, head_dim, C).astype(jnp.bfloat16)
    w1 = params["w1"].astype(jnp.bfloat16)
    w2 = params["w2"].astype(jnp.bfloat16)

    x2 = x.reshape(B * N, C)
    x_spec = pl.BlockSpec((M, C), lambda i: (i, 0))

    flops = B * (2 * N * C * 3 * C                     # qkv
                 + 4 * num_heads * N * N * head_dim    # scores + attn@v
                 + 2 * N * C * C                       # proj
                 + 4 * N * C * Hd)                     # fc1 + fc2
    transcendentals = B * (num_heads * N * N + N * Hd)
    bytes_accessed = (2 * B * N * C * 4
                      + (3 * C * C + C * C + 2 * C * Hd) * 2
                      + (5 * C + Hd) * 4)

    def build(single_buffer_weights):
        if single_buffer_weights:
            def w_spec(shape):
                # grid-invariant -> single-buffered: no DMA to hide, half the VMEM
                return pl.BlockSpec(shape, lambda i: (0,) * len(shape),
                                    pipeline_mode=pl.Buffered(1))
        else:
            def w_spec(shape):
                return pl.BlockSpec(shape, lambda i: (0,) * len(shape))

        return pl.pallas_call(
            functools.partial(transformer_block_kernel, num_heads, batch_block, N),
            out_shape=jax.ShapeDtypeStruct((B * N, C), x.dtype),
            grid_spec=pltpu.PrefetchScalarGridSpec(
                num_scalar_prefetch=0,
                grid=(nb,),
                in_specs=[
                    x_spec,                              # x (merged rows)
                    w_spec((1, C)),                      # norm1 gamma
                    w_spec((1, C)),                      # norm1 beta
                    w_spec((C, 3 * C)),                  # qkv weight (bf16, q pre-scaled)
                    w_spec((num_heads, head_dim, C)),    # proj weight, head-major (bf16)
                    w_spec((1, C)),                      # proj bias
                    w_spec((1, C)),                      # norm2 gamma
                    w_spec((1, C)),                      # norm2 beta
                    w_spec((C, Hd)),                     # mlp fc1 weight (bf16)
                    w_spec((1, Hd)),                     # mlp fc1 bias
                    w_spec((Hd, C)),                     # mlp fc2 weight (bf16)
                    w_spec((1, C)),                      # mlp fc2 bias
                ],
                out_specs=x_spec,
            ),
            compiler_params=pltpu.CompilerParams(
                dimension_semantics=("parallel",),
                vmem_limit_bytes=_vmem_limit_bytes()),
            cost_estimate=pl.CostEstimate(
                flops=flops,
                transcendentals=transcendentals,
                bytes_accessed=bytes_accessed),
        )

    args = (x2, params["g1"], params["b1"], wqkv, wp, params["bp"],
            params["g2"], params["b2"], w1, params["bm1"], w2, params["bm2"])
    try:
        out = build(True)(*args)
    except Exception:
        # pipeline_mode=pl.Buffered(1) unavailable on this JAX build: fall back to
        # default double-buffered weight specs (numerically identical).
        out = build(False)(*args)
    return out.reshape(B, N, C)


def reference(x, p, num_heads):
    """Pure-JAX f32 reference mirroring the PyTorch forward."""
    def ln(t, g, b):
        mean = t.mean(-1, keepdims=True)
        var = ((t - mean) ** 2).mean(-1, keepdims=True)
        return (t - mean) / jnp.sqrt(var + EPS) * g + b

    B, N, C = x.shape
    hd = C // num_heads
    h = ln(x, p["g1"], p["b1"])
    qkv = h @ p["wqkv"]
    qkv = qkv.reshape(B, N, 3, num_heads, hd).transpose(2, 0, 3, 1, 4)
    q, k, v = qkv[0], qkv[1], qkv[2]
    attn = (q @ jnp.swapaxes(k, -2, -1)) * hd ** (-0.5)
    attn = jax.nn.softmax(attn, axis=-1)
    out = (attn @ v).transpose(0, 2, 1, 3).reshape(B, N, C)
    out = out @ p["wp"] + p["bp"]
    x = x + out
    h2 = ln(x, p["g2"], p["b2"])
    m = h2 @ p["w1"] + p["bm1"]
    m = jax.nn.gelu(m, approximate=False)
    m = m @ p["w2"] + p["bm2"]
    return x + m


if __name__ == "__main__":
    B, N, C = 2, 8, 32
    num_heads = 4
    mlp_ratio = 4.0
    Hd = int(C * mlp_ratio)

    key = jax.random.PRNGKey(0)
    ks = jax.random.split(key, 12)
    s = 0.02
    params = {
        "g1":   1.0 + s * jax.random.normal(ks[0], (1, C), jnp.float32),
        "b1":   s * jax.random.normal(ks[1], (1, C), jnp.float32),
        "wqkv": s * jax.random.normal(ks[2], (C, 3 * C), jnp.float32),
        "wp":   s * jax.random.normal(ks[3], (C, C), jnp.float32),
        "bp":   s * jax.random.normal(ks[4], (1, C), jnp.float32),
        "g2":   1.0 + s * jax.random.normal(ks[5], (1, C), jnp.float32),
        "b2":   s * jax.random.normal(ks[6], (1, C), jnp.float32),
        "w1":   s * jax.random.normal(ks[7], (C, Hd), jnp.float32),
        "bm1":  s * jax.random.normal(ks[8], (1, Hd), jnp.float32),
        "w2":   s * jax.random.normal(ks[9], (Hd, C), jnp.float32),
        "bm2":  s * jax.random.normal(ks[10], (1, C), jnp.float32),
    }
    x = jax.random.normal(ks[11], (B, N, C), jnp.float32)

    out = jax.block_until_ready(transformer_block(x, params, num_heads))
    ref = jax.block_until_ready(reference(x, params, num_heads))

    # bf16 matmul operands + approx softmax reciprocal -> looser tolerance than pure f32
    np.testing.assert_allclose(np.asarray(out), np.asarray(ref),
                               rtol=2e-2, atol=2e-2)
    print("KERNEL_OK")
</pallas_src>

<mosaic_0001>
module attributes {stable_mosaic.version = 11 : i64} {
  func.func @transformer_block_kernel(%arg0: i32, %arg1: memref<8x32xf32, #tpu.memory_space<vmem>>, %arg2: memref<1x32xf32, #tpu.memory_space<vmem>>, %arg3: memref<1x32xf32, #tpu.memory_space<vmem>>, %arg4: memref<32x96xbf16, #tpu.memory_space<vmem>>, %arg5: memref<4x8x32xbf16, #tpu.memory_space<vmem>>, %arg6: memref<1x32xf32, #tpu.memory_space<vmem>>, %arg7: memref<1x32xf32, #tpu.memory_space<vmem>>, %arg8: memref<1x32xf32, #tpu.memory_space<vmem>>, %arg9: memref<32x128xbf16, #tpu.memory_space<vmem>>, %arg10: memref<1x128xf32, #tpu.memory_space<vmem>>, %arg11: memref<128x32xbf16, #tpu.memory_space<vmem>>, %arg12: memref<1x32xf32, #tpu.memory_space<vmem>>, %arg13: memref<8x32xf32, #tpu.memory_space<vmem>>) attributes {dimension_semantics = [#tpu.dimension_semantics<parallel>], iteration_bounds = array<i64: 2>, scalar_prefetch = 0 : i64, scratch_operands = 0 : i64, tpu.core_type = #tpu.core_type<tc>, window_params = [{transform_indices = @transform_0, window_bounds = array<i64: 8, 32>}, {pipeline_mode = #tpu.pipeline_mode<synchronous>, transform_indices = @transform_1, window_bounds = array<i64: 1, 32>}, {pipeline_mode = #tpu.pipeline_mode<synchronous>, transform_indices = @transform_2, window_bounds = array<i64: 1, 32>}, {pipeline_mode = #tpu.pipeline_mode<synchronous>, transform_indices = @transform_3, window_bounds = array<i64: 32, 96>}, {pipeline_mode = #tpu.pipeline_mode<synchronous>, transform_indices = @transform_4, window_bounds = array<i64: 4, 8, 32>}, {pipeline_mode = #tpu.pipeline_mode<synchronous>, transform_indices = @transform_5, window_bounds = array<i64: 1, 32>}, {pipeline_mode = #tpu.pipeline_mode<synchronous>, transform_indices = @transform_6, window_bounds = array<i64: 1, 32>}, {pipeline_mode = #tpu.pipeline_mode<synchronous>, transform_indices = @transform_7, window_bounds = array<i64: 1, 32>}, {pipeline_mode = #tpu.pipeline_mode<synchronous>, transform_indices = @transform_8, window_bounds = array<i64: 32, 128>}, {pipeline_mode = #tpu.pipeline_mode<synchronous>, transform_indices = @transform_9, window_bounds = array<i64: 1, 128>}, {pipeline_mode = #tpu.pipeline_mode<synchronous>, transform_indices = @transform_10, window_bounds = array<i64: 128, 32>}, {pipeline_mode = #tpu.pipeline_mode<synchronous>, transform_indices = @transform_11, window_bounds = array<i64: 1, 32>}, {transform_indices = @transform_12, window_bounds = array<i64: 8, 32>}]} {
    %c0 = arith.constant 0 : index
    %c0_0 = arith.constant 0 : index
    %0 = vector.load %arg1[%c0, %c0_0] : memref<8x32xf32, #tpu.memory_space<vmem>>, vector<8x32xf32>
    %c0_1 = arith.constant 0 : index
    %c0_2 = arith.constant 0 : index
    %1 = vector.load %arg2[%c0_1, %c0_2] : memref<1x32xf32, #tpu.memory_space<vmem>>, vector<1x32xf32>
    %c0_3 = arith.constant 0 : index
    %c0_4 = arith.constant 0 : index
    %2 = vector.load %arg3[%c0_3, %c0_4] : memref<1x32xf32, #tpu.memory_space<vmem>>, vector<1x32xf32>
    %cst = arith.constant dense<0.000000e+00> : vector<8xf32>
    %3 = vector.multi_reduction <add>, %0, %cst [1] : vector<8x32xf32> to vector<8xf32>
    %4 = vector.shape_cast %3 : vector<8xf32> to vector<8x1xf32>
    %cst_5 = arith.constant 3.200000e+01 : f32
    %5 = vector.broadcast %cst_5 : f32 to vector<8x1xf32>
    %6 = arith.divf %4, %5 : vector<8x1xf32>
    %7 = vector.broadcast %6 : vector<8x1xf32> to vector<8x32xf32>
    %8 = arith.subf %0, %7 : vector<8x32xf32>
    %9 = arith.mulf %8, %8 : vector<8x32xf32>
    %cst_6 = arith.constant dense<0.000000e+00> : vector<8xf32>
    %10 = vector.multi_reduction <add>, %9, %cst_6 [1] : vector<8x32xf32> to vector<8xf32>
    %11 = vector.shape_cast %10 : vector<8xf32> to vector<8x1xf32>
    %cst_7 = arith.constant 3.200000e+01 : f32
    %12 = vector.broadcast %cst_7 : f32 to vector<8x1xf32>
    %13 = arith.divf %11, %12 : vector<8x1xf32>
    %14 = vector.broadcast %6 : vector<8x1xf32> to vector<8x32xf32>
    %15 = arith.subf %0, %14 : vector<8x32xf32>
    %cst_8 = arith.constant 9.99999974E-6 : f32
    %16 = vector.broadcast %cst_8 : f32 to vector<8x1xf32>
    %17 = arith.addf %13, %16 : vector<8x1xf32>
    %18 = math.rsqrt %17 : vector<8x1xf32>
    %19 = vector.broadcast %18 : vector<8x1xf32> to vector<8x32xf32>
    %20 = arith.mulf %15, %19 : vector<8x32xf32>
    %21 = vector.broadcast %1 : vector<1x32xf32> to vector<8x32xf32>
    %22 = arith.mulf %20, %21 : vector<8x32xf32>
    %23 = vector.broadcast %2 : vector<1x32xf32> to vector<8x32xf32>
    %24 = arith.addf %22, %23 : vector<8x32xf32>
    %25 = arith.truncf %24 : vector<8x32xf32> to vector<8x32xbf16>
    %c0_9 = arith.constant 0 : index
    %c0_10 = arith.constant 0 : index
    %26 = vector.load %arg4[%c0_9, %c0_10] : memref<32x96xbf16, #tpu.memory_space<vmem>>, vector<32x96xbf16>
    %cst_11 = arith.constant dense<0.000000e+00> : vector<8x96xf32>
    %27 = tpu.matmul %25, %26, %cst_11 {dimension_numbers = #tpu.dot_dimension_numbers<[1], [0], [0], [1], [0, 0, 1, 1], [], []>} : vector<8x32xbf16>, vector<32x96xbf16>, vector<8x96xf32> -> vector<8x96xf32>
    %c0_12 = arith.constant 0 : index
    %c0_13 = arith.constant 0 : index
    %28 = vector.load %arg6[%c0_12, %c0_13] : memref<1x32xf32, #tpu.memory_space<vmem>>, vector<1x32xf32>
    %29 = vector.shape_cast %28 : vector<1x32xf32> to vector<1x32xf32>
    %30 = vector.broadcast %29 : vector<1x32xf32> to vector<8x32xf32>
    %31 = vector.extract_strided_slice %27 {offsets = [0, 0], sizes = [8, 8], strides = [1, 1]} : vector<8x96xf32> to vector<8x8xf32>
    %32 = arith.truncf %31 : vector<8x8xf32> to vector<8x8xbf16>
    %33 = vector.shape_cast %32 : vector<8x8xbf16> to vector<1x8x8xbf16>
    %34 = vector.extract_strided_slice %27 {offsets = [0, 32], sizes = [8, 8], strides = [1, 1]} : vector<8x96xf32> to vector<8x8xf32>
    %35 = arith.truncf %34 : vector<8x8xf32> to vector<8x8xbf16>
    %36 = vector.shape_cast %35 : vector<8x8xbf16> to vector<1x8x8xbf16>
    %37 = vector.extract_strided_slice %27 {offsets = [0, 64], sizes = [8, 8], strides = [1, 1]} : vector<8x96xf32> to vector<8x8xf32>
    %38 = arith.truncf %37 : vector<8x8xf32> to vector<8x8xbf16>
    %39 = vector.shape_cast %38 : vector<8x8xbf16> to vector<1x8x8xbf16>
    "tpu.trace_start"() <{level = 10 : i32, message = "bqd,bkd->bqk"}> : () -> ()
    %cst_14 = arith.constant dense<0.000000e+00> : vector<1x8x8xf32>
    %40 = tpu.matmul %33, %36, %cst_14 {dimension_numbers = #tpu.dot_dimension_numbers<[2], [2], [1], [1], [0, 0, 0, 1, 1, 1], [0], [0]>} : vector<1x8x8xbf16>, vector<1x8x8xbf16>, vector<1x8x8xf32> -> vector<1x8x8xf32>
    "tpu.trace_stop"() : () -> ()
    %cst_15 = arith.constant dense<0xFF800000> : vector<1x8xf32>
    %41 = vector.multi_reduction <maximumf>, %40, %cst_15 [2] : vector<1x8x8xf32> to vector<1x8xf32>
    %42 = vector.shape_cast %41 : vector<1x8xf32> to vector<1x8x1xf32>
    %43 = vector.broadcast %42 : vector<1x8x1xf32> to vector<1x8x8xf32>
    %44 = arith.subf %40, %43 : vector<1x8x8xf32>
    %45 = math.exp %44 : vector<1x8x8xf32>
    %cst_16 = arith.constant dense<0.000000e+00> : vector<1x8xf32>
    %46 = vector.multi_reduction <add>, %45, %cst_16 [2] : vector<1x8x8xf32> to vector<1x8xf32>
    %47 = vector.shape_cast %46 : vector<1x8xf32> to vector<1x8x1xf32>
    %48 = tpu.reciprocal %47 {approx = true} : vector<1x8x1xf32> -> vector<1x8x1xf32>
    %49 = vector.broadcast %48 : vector<1x8x1xf32> to vector<1x8x8xf32>
    %50 = arith.mulf %45, %49 : vector<1x8x8xf32>
    %51 = arith.truncf %50 : vector<1x8x8xf32> to vector<1x8x8xbf16>
    "tpu.trace_start"() <{level = 10 : i32, message = "bqk,bkd->bqd"}> : () -> ()
    %cst_17 = arith.constant dense<0.000000e+00> : vector<1x8x8xf32>
    %52 = tpu.matmul %51, %39, %cst_17 {dimension_numbers = #tpu.dot_dimension_numbers<[2], [1], [1], [2], [0, 0, 0, 1, 1, 2], [0], [0]>} : vector<1x8x8xbf16>, vector<1x8x8xbf16>, vector<1x8x8xf32> -> vector<1x8x8xf32>
    "tpu.trace_stop"() : () -> ()
    %53 = vector.shape_cast %52 : vector<1x8x8xf32> to vector<8x8xf32>
    %54 = arith.truncf %53 : vector<8x8xf32> to vector<8x8xbf16>
    %c0_18 = arith.constant 0 : index
    %c0_19 = arith.constant 0 : index
    %c0_20 = arith.constant 0 : index
    %55 = vector.load %arg5[%c0_18, %c0_19, %c0_20] : memref<4x8x32xbf16, #tpu.memory_space<vmem>>, vector<1x8x32xbf16>
    %56 = vector.shape_cast %55 : vector<1x8x32xbf16> to vector<8x32xbf16>
    %cst_21 = arith.constant dense<0.000000e+00> : vector<8x32xf32>
    %57 = tpu.matmul %54, %56, %cst_21 {dimension_numbers = #tpu.dot_dimension_numbers<[1], [0], [0], [1], [0, 0, 1, 1], [], []>} : vector<8x8xbf16>, vector<8x32xbf16>, vector<8x32xf32> -> vector<8x32xf32>
    %58 = arith.addf %30, %57 : vector<8x32xf32>
    %59 = vector.extract_strided_slice %27 {offsets = [0, 8], sizes = [8, 8], strides = [1, 1]} : vector<8x96xf32> to vector<8x8xf32>
    %60 = arith.truncf %59 : vector<8x8xf32> to vector<8x8xbf16>
    %61 = vector.shape_cast %60 : vector<8x8xbf16> to vector<1x8x8xbf16>
    %62 = vector.extract_strided_slice %27 {offsets = [0, 40], sizes = [8, 8], strides = [1, 1]} : vector<8x96xf32> to vector<8x8xf32>
    %63 = arith.truncf %62 : vector<8x8xf32> to vector<8x8xbf16>
    %64 = vector.shape_cast %63 : vector<8x8xbf16> to vector<1x8x8xbf16>
    %65 = vector.extract_strided_slice %27 {offsets = [0, 72], sizes = [8, 8], strides = [1, 1]} : vector<8x96xf32> to vector<8x8xf32>
    %66 = arith.truncf %65 : vector<8x8xf32> to vector<8x8xbf16>
    %67 = vector.shape_cast %66 : vector<8x8xbf16> to vector<1x8x8xbf16>
    "tpu.trace_start"() <{level = 10 : i32, message = "bqd,bkd->bqk"}> : () -> ()
    %cst_22 = arith.constant dense<0.000000e+00> : vector<1x8x8xf32>
    %68 = tpu.matmul %61, %64, %cst_22 {dimension_numbers = #tpu.dot_dimension_numbers<[2], [2], [1], [1], [0, 0, 0, 1, 1, 1], [0], [0]>} : vector<1x8x8xbf16>, vector<1x8x8xbf16>, vector<1x8x8xf32> -> vector<1x8x8xf32>
    "tpu.trace_stop"() : () -> ()
    %cst_23 = arith.constant dense<0xFF800000> : vector<1x8xf32>
    %69 = vector.multi_reduction <maximumf>, %68, %cst_23 [2] : vector<1x8x8xf32> to vector<1x8xf32>
    %70 = vector.shape_cast %69 : vector<1x8xf32> to vector<1x8x1xf32>
    %71 = vector.broadcast %70 : vector<1x8x1xf32> to vector<1x8x8xf32>
    %72 = arith.subf %68, %71 : vector<1x8x8xf32>
    %73 = math.exp %72 : vector<1x8x8xf32>
    %cst_24 = arith.constant dense<0.000000e+00> : vector<1x8xf32>
    %74 = vector.multi_reduction <add>, %73, %cst_24 [2] : vector<1x8x8xf32> to vector<1x8xf32>
    %75 = vector.shape_cast %74 : vector<1x8xf32> to vector<1x8x1xf32>
    %76 = tpu.reciprocal %75 {approx = true} : vector<1x8x1xf32> -> vector<1x8x1xf32>
    %77 = vector.broadcast %76 : vector<1x8x1xf32> to vector<1x8x8xf32>
    %78 = arith.mulf %73, %77 : vector<1x8x8xf32>
    %79 = arith.truncf %78 : vector<1x8x8xf32> to vector<1x8x8xbf16>
    "tpu.trace_start"() <{level = 10 : i32, message = "bqk,bkd->bqd"}> : () -> ()
    %cst_25 = arith.constant dense<0.000000e+00> : vector<1x8x8xf32>
    %80 = tpu.matmul %79, %67, %cst_25 {dimension_numbers = #tpu.dot_dimension_numbers<[2], [1], [1], [2], [0, 0, 0, 1, 1, 2], [0], [0]>} : vector<1x8x8xbf16>, vector<1x8x8xbf16>, vector<1x8x8xf32> -> vector<1x8x8xf32>
    "tpu.trace_stop"() : () -> ()
    %81 = vector.shape_cast %80 : vector<1x8x8xf32> to vector<8x8xf32>
    %82 = arith.truncf %81 : vector<8x8xf32> to vector<8x8xbf16>
    %c1 = arith.constant 1 : index
    %c0_26 = arith.constant 0 : index
    %c0_27 = arith.constant 0 : index
    %83 = vector.load %arg5[%c1, %c0_26, %c0_27] : memref<4x8x32xbf16, #tpu.memory_space<vmem>>, vector<1x8x32xbf16>
    %84 = vector.shape_cast %83 : vector<1x8x32xbf16> to vector<8x32xbf16>
    %cst_28 = arith.constant dense<0.000000e+00> : vector<8x32xf32>
    %85 = tpu.matmul %82, %84, %cst_28 {dimension_numbers = #tpu.dot_dimension_numbers<[1], [0], [0], [1], [0, 0, 1, 1], [], []>} : vector<8x8xbf16>, vector<8x32xbf16>, vector<8x32xf32> -> vector<8x32xf32>
    %86 = arith.addf %58, %85 : vector<8x32xf32>
    %87 = vector.extract_strided_slice %27 {offsets = [0, 16], sizes = [8, 8], strides = [1, 1]} : vector<8x96xf32> to vector<8x8xf32>
    %88 = arith.truncf %87 : vector<8x8xf32> to vector<8x8xbf16>
    %89 = vector.shape_cast %88 : vector<8x8xbf16> to vector<1x8x8xbf16>
    %90 = vector.extract_strided_slice %27 {offsets = [0, 48], sizes = [8, 8], strides = [1, 1]} : vector<8x96xf32> to vector<8x8xf32>
    %91 = arith.truncf %90 : vector<8x8xf32> to vector<8x8xbf16>
    %92 = vector.shape_cast %91 : vector<8x8xbf16> to vector<1x8x8xbf16>
    %93 = vector.extract_strided_slice %27 {offsets = [0, 80], sizes = [8, 8], strides = [1, 1]} : vector<8x96xf32> to vector<8x8xf32>
    %94 = arith.truncf %93 : vector<8x8xf32> to vector<8x8xbf16>
    %95 = vector.shape_cast %94 : vector<8x8xbf16> to vector<1x8x8xbf16>
    "tpu.trace_start"() <{level = 10 : i32, message = "bqd,bkd->bqk"}> : () -> ()
    %cst_29 = arith.constant dense<0.000000e+00> : vector<1x8x8xf32>
    %96 = tpu.matmul %89, %92, %cst_29 {dimension_numbers = #tpu.dot_dimension_numbers<[2], [2], [1], [1], [0, 0, 0, 1, 1, 1], [0], [0]>} : vector<1x8x8xbf16>, vector<1x8x8xbf16>, vector<1x8x8xf32> -> vector<1x8x8xf32>
    "tpu.trace_stop"() : () -> ()
    %cst_30 = arith.constant dense<0xFF800000> : vector<1x8xf32>
    %97 = vector.multi_reduction <maximumf>, %96, %cst_30 [2] : vector<1x8x8xf32> to vector<1x8xf32>
    %98 = vector.shape_cast %97 : vector<1x8xf32> to vector<1x8x1xf32>
    %99 = vector.broadcast %98 : vector<1x8x1xf32> to vector<1x8x8xf32>
    %100 = arith.subf %96, %99 : vector<1x8x8xf32>
    %101 = math.exp %100 : vector<1x8x8xf32>
    %cst_31 = arith.constant dense<0.000000e+00> : vector<1x8xf32>
    %102 = vector.multi_reduction <add>, %101, %cst_31 [2] : vector<1x8x8xf32> to vector<1x8xf32>
    %103 = vector.shape_cast %102 : vector<1x8xf32> to vector<1x8x1xf32>
    %104 = tpu.reciprocal %103 {approx = true} : vector<1x8x1xf32> -> vector<1x8x1xf32>
    %105 = vector.broadcast %104 : vector<1x8x1xf32> to vector<1x8x8xf32>
    %106 = arith.mulf %101, %105 : vector<1x8x8xf32>
    %107 = arith.truncf %106 : vector<1x8x8xf32> to vector<1x8x8xbf16>
    "tpu.trace_start"() <{level = 10 : i32, message = "bqk,bkd->bqd"}> : () -> ()
    %cst_32 = arith.constant dense<0.000000e+00> : vector<1x8x8xf32>
    %108 = tpu.matmul %107, %95, %cst_32 {dimension_numbers = #tpu.dot_dimension_numbers<[2], [1], [1], [2], [0, 0, 0, 1, 1, 2], [0], [0]>} : vector<1x8x8xbf16>, vector<1x8x8xbf16>, vector<1x8x8xf32> -> vector<1x8x8xf32>
    "tpu.trace_stop"() : () -> ()
    %109 = vector.shape_cast %108 : vector<1x8x8xf32> to vector<8x8xf32>
    %110 = arith.truncf %109 : vector<8x8xf32> to vector<8x8xbf16>
    %c2 = arith.constant 2 : index
    %c0_33 = arith.constant 0 : index
    %c0_34 = arith.constant 0 : index
    %111 = vector.load %arg5[%c2, %c0_33, %c0_34] : memref<4x8x32xbf16, #tpu.memory_space<vmem>>, vector<1x8x32xbf16>
    %112 = vector.shape_cast %111 : vector<1x8x32xbf16> to vector<8x32xbf16>
    %cst_35 = arith.constant dense<0.000000e+00> : vector<8x32xf32>
    %113 = tpu.matmul %110, %112, %cst_35 {dimension_numbers = #tpu.dot_dimension_numbers<[1], [0], [0], [1], [0, 0, 1, 1], [], []>} : vector<8x8xbf16>, vector<8x32xbf16>, vector<8x32xf32> -> vector<8x32xf32>
    %114 = arith.addf %86, %113 : vector<8x32xf32>
    %115 = vector.extract_strided_slice %27 {offsets = [0, 24], sizes = [8, 8], strides = [1, 1]} : vector<8x96xf32> to vector<8x8xf32>
    %116 = arith.truncf %115 : vector<8x8xf32> to vector<8x8xbf16>
    %117 = vector.shape_cast %116 : vector<8x8xbf16> to vector<1x8x8xbf16>
    %118 = vector.extract_strided_slice %27 {offsets = [0, 56], sizes = [8, 8], strides = [1, 1]} : vector<8x96xf32> to vector<8x8xf32>
    %119 = arith.truncf %118 : vector<8x8xf32> to vector<8x8xbf16>
    %120 = vector.shape_cast %119 : vector<8x8xbf16> to vector<1x8x8xbf16>
    %121 = vector.extract_strided_slice %27 {offsets = [0, 88], sizes = [8, 8], strides = [1, 1]} : vector<8x96xf32> to vector<8x8xf32>
    %122 = arith.truncf %121 : vector<8x8xf32> to vector<8x8xbf16>
    %123 = vector.shape_cast %122 : vector<8x8xbf16> to vector<1x8x8xbf16>
    "tpu.trace_start"() <{level = 10 : i32, message = "bqd,bkd->bqk"}> : () -> ()
    %cst_36 = arith.constant dense<0.000000e+00> : vector<1x8x8xf32>
    %124 = tpu.matmul %117, %120, %cst_36 {dimension_numbers = #tpu.dot_dimension_numbers<[2], [2], [1], [1], [0, 0, 0, 1, 1, 1], [0], [0]>} : vector<1x8x8xbf16>, vector<1x8x8xbf16>, vector<1x8x8xf32> -> vector<1x8x8xf32>
    "tpu.trace_stop"() : () -> ()
    %cst_37 = arith.constant dense<0xFF800000> : vector<1x8xf32>
    %125 = vector.multi_reduction <maximumf>, %124, %cst_37 [2] : vector<1x8x8xf32> to vector<1x8xf32>
    %126 = vector.shape_cast %125 : vector<1x8xf32> to vector<1x8x1xf32>
    %127 = vector.broadcast %126 : vector<1x8x1xf32> to vector<1x8x8xf32>
    %128 = arith.subf %124, %127 : vector<1x8x8xf32>
    %129 = math.exp %128 : vector<1x8x8xf32>
    %cst_38 = arith.constant dense<0.000000e+00> : vector<1x8xf32>
    %130 = vector.multi_reduction <add>, %129, %cst_38 [2] : vector<1x8x8xf32> to vector<1x8xf32>
    %131 = vector.shape_cast %130 : vector<1x8xf32> to vector<1x8x1xf32>
    %132 = tpu.reciprocal %131 {approx = true} : vector<1x8x1xf32> -> vector<1x8x1xf32>
    %133 = vector.broadcast %132 : vector<1x8x1xf32> to vector<1x8x8xf32>
    %134 = arith.mulf %129, %133 : vector<1x8x8xf32>
    %135 = arith.truncf %134 : vector<1x8x8xf32> to vector<1x8x8xbf16>
    "tpu.trace_start"() <{level = 10 : i32, message = "bqk,bkd->bqd"}> : () -> ()
    %cst_39 = arith.constant dense<0.000000e+00> : vector<1x8x8xf32>
    %136 = tpu.matmul %135, %123, %cst_39 {dimension_numbers = #tpu.dot_dimension_numbers<[2], [1], [1], [2], [0, 0, 0, 1, 1, 2], [0], [0]>} : vector<1x8x8xbf16>, vector<1x8x8xbf16>, vector<1x8x8xf32> -> vector<1x8x8xf32>
    "tpu.trace_stop"() : () -> ()
    %137 = vector.shape_cast %136 : vector<1x8x8xf32> to vector<8x8xf32>
    %138 = arith.truncf %137 : vector<8x8xf32> to vector<8x8xbf16>
    %c3 = arith.constant 3 : index
    %c0_40 = arith.constant 0 : index
    %c0_41 = arith.constant 0 : index
    %139 = vector.load %arg5[%c3, %c0_40, %c0_41] : memref<4x8x32xbf16, #tpu.memory_space<vmem>>, vector<1x8x32xbf16>
    %140 = vector.shape_cast %139 : vector<1x8x32xbf16> to vector<8x32xbf16>
    %cst_42 = arith.constant dense<0.000000e+00> : vector<8x32xf32>
    %141 = tpu.matmul %138, %140, %cst_42 {dimension_numbers = #tpu.dot_dimension_numbers<[1], [0], [0], [1], [0, 0, 1, 1], [], []>} : vector<8x8xbf16>, vector<8x32xbf16>, vector<8x32xf32> -> vector<8x32xf32>
    %142 = arith.addf %114, %141 : vector<8x32xf32>
    %143 = arith.addf %0, %142 : vector<8x32xf32>
    %c0_43 = arith.constant 0 : index
    %c0_44 = arith.constant 0 : index
    %144 = vector.load %arg7[%c0_43, %c0_44] : memref<1x32xf32, #tpu.memory_space<vmem>>, vector<1x32xf32>
    %c0_45 = arith.constant 0 : index
    %c0_46 = arith.constant 0 : index
    %145 = vector.load %arg8[%c0_45, %c0_46] : memref<1x32xf32, #tpu.memory_space<vmem>>, vector<1x32xf32>
    %cst_47 = arith.constant dense<0.000000e+00> : vector<8xf32>
    %146 = vector.multi_reduction <add>, %143, %cst_47 [1] : vector<8x32xf32> to vector<8xf32>
    %147 = vector.shape_cast %146 : vector<8xf32> to vector<8x1xf32>
    %cst_48 = arith.constant 3.200000e+01 : f32
    %148 = vector.broadcast %cst_48 : f32 to vector<8x1xf32>
    %149 = arith.divf %147, %148 : vector<8x1xf32>
    %150 = vector.broadcast %149 : vector<8x1xf32> to vector<8x32xf32>
    %151 = arith.subf %143, %150 : vector<8x32xf32>
    %152 = arith.mulf %151, %151 : vector<8x32xf32>
    %cst_49 = arith.constant dense<0.000000e+00> : vector<8xf32>
    %153 = vector.multi_reduction <add>, %152, %cst_49 [1] : vector<8x32xf32> to vector<8xf32>
    %154 = vector.shape_cast %153 : vector<8xf32> to vector<8x1xf32>
    %cst_50 = arith.constant 3.200000e+01 : f32
    %155 = vector.broadcast %cst_50 : f32 to vector<8x1xf32>
    %156 = arith.divf %154, %155 : vector<8x1xf32>
    %157 = vector.broadcast %149 : vector<8x1xf32> to vector<8x32xf32>
    %158 = arith.subf %143, %157 : vector<8x32xf32>
    %cst_51 = arith.constant 9.99999974E-6 : f32
    %159 = vector.broadcast %cst_51 : f32 to vector<8x1xf32>
    %160 = arith.addf %156, %159 : vector<8x1xf32>
    %161 = math.rsqrt %160 : vector<8x1xf32>
    %162 = vector.broadcast %161 : vector<8x1xf32> to vector<8x32xf32>
    %163 = arith.mulf %158, %162 : vector<8x32xf32>
    %164 = vector.broadcast %144 : vector<1x32xf32> to vector<8x32xf32>
    %165 = arith.mulf %163, %164 : vector<8x32xf32>
    %166 = vector.broadcast %145 : vector<1x32xf32> to vector<8x32xf32>
    %167 = arith.addf %165, %166 : vector<8x32xf32>
    %168 = arith.truncf %167 : vector<8x32xf32> to vector<8x32xbf16>
    %c0_52 = arith.constant 0 : index
    %c0_53 = arith.constant 0 : index
    %169 = vector.load %arg9[%c0_52, %c0_53] : memref<32x128xbf16, #tpu.memory_space<vmem>>, vector<32x128xbf16>
    %cst_54 = arith.constant dense<0.000000e+00> : vector<8x128xf32>
    %170 = tpu.matmul %168, %169, %cst_54 {dimension_numbers = #tpu.dot_dimension_numbers<[1], [0], [0], [1], [0, 0, 1, 1], [], []>} : vector<8x32xbf16>, vector<32x128xbf16>, vector<8x128xf32> -> vector<8x128xf32>
    %c0_55 = arith.constant 0 : index
    %c0_56 = arith.constant 0 : index
    %171 = vector.load %arg10[%c0_55, %c0_56] : memref<1x128xf32, #tpu.memory_space<vmem>>, vector<1x128xf32>
    %172 = vector.broadcast %171 : vector<1x128xf32> to vector<8x128xf32>
    %173 = arith.addf %170, %172 : vector<8x128xf32>
    %cst_57 = arith.constant 5.000000e-01 : f32
    %174 = vector.broadcast %cst_57 : f32 to vector<8x128xf32>
    %175 = arith.mulf %174, %173 : vector<8x128xf32>
    %cst_58 = arith.constant 0.707106769 : f32
    %176 = vector.broadcast %cst_58 : f32 to vector<8x128xf32>
    %177 = arith.mulf %173, %176 : vector<8x128xf32>
    %178 = math.erf %177 : vector<8x128xf32>
    %cst_59 = arith.constant 1.000000e+00 : f32
    %179 = vector.broadcast %cst_59 : f32 to vector<8x128xf32>
    %180 = arith.addf %179, %178 : vector<8x128xf32>
    %181 = arith.mulf %175, %180 : vector<8x128xf32>
    %182 = arith.truncf %181 : vector<8x128xf32> to vector<8x128xbf16>
    %c0_60 = arith.constant 0 : index
    %c0_61 = arith.constant 0 : index
    %183 = vector.load %arg11[%c0_60, %c0_61] : memref<128x32xbf16, #tpu.memory_space<vmem>>, vector<128x32xbf16>
    %cst_62 = arith.constant dense<0.000000e+00> : vector<8x32xf32>
    %184 = tpu.matmul %182, %183, %cst_62 {dimension_numbers = #tpu.dot_dimension_numbers<[1], [0], [0], [1], [0, 0, 1, 1], [], []>} : vector<8x128xbf16>, vector<128x32xbf16>, vector<8x32xf32> -> vector<8x32xf32>
    %c0_63 = arith.constant 0 : index
    %c0_64 = arith.constant 0 : index
    %185 = vector.load %arg12[%c0_63, %c0_64] : memref<1x32xf32, #tpu.memory_space<vmem>>, vector<1x32xf32>
    %186 = vector.broadcast %185 : vector<1x32xf32> to vector<8x32xf32>
    %187 = arith.addf %184, %186 : vector<8x32xf32>
    %188 = arith.addf %143, %187 : vector<8x32xf32>
    %c0_65 = arith.constant 0 : index
    %c0_66 = arith.constant 0 : index
    %189 = vector.load %arg13[%c0_65, %c0_66] : memref<8x32xf32, #tpu.memory_space<vmem>>, vector<8x32xf32>
    tpu.vector_store %arg13[%c0_65, %c0_66], %188 {strides = array<i32>} : memref<8x32xf32, #tpu.memory_space<vmem>>, vector<8x32xf32>,
    return
  }
  func.func @transform_0(%arg0: i32) -> (i32, i32) {
    %c0_i32 = arith.constant 0 : i32
    %c0_i32_0 = arith.constant 0 : i32
    return %arg0, %c0_i32 : i32, i32
  }
  func.func @transform_1(%arg0: i32) -> (i32, i32) {
    %c0_i32 = arith.constant 0 : i32
    %c0_i32_0 = arith.constant 0 : i32
    %c0_i32_1 = arith.constant 0 : i32
    return %c0_i32, %c0_i32_0 : i32, i32
  }
  func.func @transform_2(%arg0: i32) -> (i32, i32) {
    %c0_i32 = arith.constant 0 : i32
    %c0_i32_0 = arith.constant 0 : i32
    %c0_i32_1 = arith.constant 0 : i32
    return %c0_i32, %c0_i32_0 : i32, i32
  }
  func.func @transform_3(%arg0: i32) -> (i32, i32) {
    %c0_i32 = arith.constant 0 : i32
    %c0_i32_0 = arith.constant 0 : i32
    %c0_i32_1 = arith.constant 0 : i32
    return %c0_i32, %c0_i32_0 : i32, i32
  }
  func.func @transform_4(%arg0: i32) -> (i32, i32, i32) {
    %c0_i32 = arith.constant 0 : i32
    %c0_i32_0 = arith.constant 0 : i32
    %c0_i32_1 = arith.constant 0 : i32
    %c0_i32_2 = arith.constant 0 : i32
    return %c0_i32, %c0_i32_0, %c0_i32_1 : i32, i32, i32
  }
  func.func @transform_5(%arg0: i32) -> (i32, i32) {
    %c0_i32 = arith.constant 0 : i32
    %c0_i32_0 = arith.constant 0 : i32
    %c0_i32_1 = arith.constant 0 : i32
    return %c0_i32, %c0_i32_0 : i32, i32
  }
  func.func @transform_6(%arg0: i32) -> (i32, i32) {
    %c0_i32 = arith.constant 0 : i32
    %c0_i32_0 = arith.constant 0 : i32
    %c0_i32_1 = arith.constant 0 : i32
    return %c0_i32, %c0_i32_0 : i32, i32
  }
  func.func @transform_7(%arg0: i32) -> (i32, i32) {
    %c0_i32 = arith.constant 0 : i32
    %c0_i32_0 = arith.constant 0 : i32
    %c0_i32_1 = arith.constant 0 : i32
    return %c0_i32, %c0_i32_0 : i32, i32
  }
  func.func @transform_8(%arg0: i32) -> (i32, i32) {
    %c0_i32 = arith.constant 0 : i32
    %c0_i32_0 = arith.constant 0 : i32
    %c0_i32_1 = arith.constant 0 : i32
    return %c0_i32, %c0_i32_0 : i32, i32
  }
  func.func @transform_9(%arg0: i32) -> (i32, i32) {
    %c0_i32 = arith.constant 0 : i32
    %c0_i32_0 = arith.constant 0 : i32
    %c0_i32_1 = arith.constant 0 : i32
    return %c0_i32, %c0_i32_0 : i32, i32
  }
  func.func @transform_10(%arg0: i32) -> (i32, i32) {
    %c0_i32 = arith.constant 0 : i32
    %c0_i32_0 = arith.constant 0 : i32
    %c0_i32_1 = arith.constant 0 : i32
    return %c0_i32, %c0_i32_0 : i32, i32
  }
  func.func @transform_11(%arg0: i32) -> (i32, i32) {
    %c0_i32 = arith.constant 0 : i32
    %c0_i32_0 = arith.constant 0 : i32
    %c0_i32_1 = arith.constant 0 : i32
    return %c0_i32, %c0_i32_0 : i32, i32
  }
  func.func @transform_12(%arg0: i32) -> (i32, i32) {
    %c0_i32 = arith.constant 0 : i32
    %c0_i32_0 = arith.constant 0 : i32
    return %arg0, %c0_i32 : i32, i32
  }
}

module attributes {stable_mosaic.version = 11 : i64} {
  func.func @transformer_block_kernel(%arg0: i32, %arg1: memref<8x32xf32, #tpu.memory_space<vmem>>, %arg2: memref<1x32xf32, #tpu.memory_space<vmem>>, %arg3: memref<1x32xf32, #tpu.memory_space<vmem>>, %arg4: memref<32x96xbf16, #tpu.memory_space<vmem>>, %arg5: memref<4x8x32xbf16, #tpu.memory_space<vmem>>, %arg6: memref<1x32xf32, #tpu.memory_space<vmem>>, %arg7: memref<1x32xf32, #tpu.memory_space<vmem>>, %arg8: memref<1x32xf32, #tpu.memory_space<vmem>>, %arg9: memref<32x128xbf16, #tpu.memory_space<vmem>>, %arg10: memref<1x128xf32, #tpu.memory_space<vmem>>, %arg11: memref<128x32xbf16, #tpu.memory_space<vmem>>, %arg12: memref<1x32xf32, #tpu.memory_space<vmem>>, %arg13: memref<8x32xf32, #tpu.memory_space<vmem>>) attributes {dimension_semantics = [#tpu.dimension_semantics<parallel>], iteration_bounds = array<i64: 2>, scalar_prefetch = 0 : i64, scratch_operands = 0 : i64, tpu.core_type = #tpu.core_type<tc>, window_params = [{transform_indices = @transform_0, window_bounds = array<i64: 8, 32>}, {pipeline_mode = #tpu.pipeline_mode<synchronous>, transform_indices = @transform_1, window_bounds = array<i64: 1, 32>}, {pipeline_mode = #tpu.pipeline_mode<synchronous>, transform_indices = @transform_2, window_bounds = array<i64: 1, 32>}, {pipeline_mode = #tpu.pipeline_mode<synchronous>, transform_indices = @transform_3, window_bounds = array<i64: 32, 96>}, {pipeline_mode = #tpu.pipeline_mode<synchronous>, transform_indices = @transform_4, window_bounds = array<i64: 4, 8, 32>}, {pipeline_mode = #tpu.pipeline_mode<synchronous>, transform_indices = @transform_5, window_bounds = array<i64: 1, 32>}, {pipeline_mode = #tpu.pipeline_mode<synchronous>, transform_indices = @transform_6, window_bounds = array<i64: 1, 32>}, {pipeline_mode = #tpu.pipeline_mode<synchronous>, transform_indices = @transform_7, window_bounds = array<i64: 1, 32>}, {pipeline_mode = #tpu.pipeline_mode<synchronous>, transform_indices = @transform_8, window_bounds = array<i64: 32, 128>}, {pipeline_mode = #tpu.pipeline_mode<synchronous>, transform_indices = @transform_9, window_bounds = array<i64: 1, 128>}, {pipeline_mode = #tpu.pipeline_mode<synchronous>, transform_indices = @transform_10, window_bounds = array<i64: 128, 32>}, {pipeline_mode = #tpu.pipeline_mode<synchronous>, transform_indices = @transform_11, window_bounds = array<i64: 1, 32>}, {transform_indices = @transform_12, window_bounds = array<i64: 8, 32>}]} {
    %c0 = arith.constant 0 : index
    %c0_0 = arith.constant 0 : index
    %0 = vector.load %arg1[%c0, %c0_0] : memref<8x32xf32, #tpu.memory_space<vmem>>, vector<8x32xf32>
    %c0_1 = arith.constant 0 : index
    %c0_2 = arith.constant 0 : index
    %1 = vector.load %arg2[%c0_1, %c0_2] : memref<1x32xf32, #tpu.memory_space<vmem>>, vector<1x32xf32>
    %c0_3 = arith.constant 0 : index
    %c0_4 = arith.constant 0 : index
    %2 = vector.load %arg3[%c0_3, %c0_4] : memref<1x32xf32, #tpu.memory_space<vmem>>, vector<1x32xf32>
    %cst = arith.constant dense<0.000000e+00> : vector<8xf32>
    %3 = vector.multi_reduction <add>, %0, %cst [1] : vector<8x32xf32> to vector<8xf32>
    %4 = vector.shape_cast %3 : vector<8xf32> to vector<8x1xf32>
    %cst_5 = arith.constant 3.200000e+01 : f32
    %5 = vector.broadcast %cst_5 : f32 to vector<8x1xf32>
    %6 = arith.divf %4, %5 : vector<8x1xf32>
    %7 = vector.broadcast %6 : vector<8x1xf32> to vector<8x32xf32>
    %8 = arith.subf %0, %7 : vector<8x32xf32>
    %9 = arith.mulf %8, %8 : vector<8x32xf32>
    %cst_6 = arith.constant dense<0.000000e+00> : vector<8xf32>
    %10 = vector.multi_reduction <add>, %9, %cst_6 [1] : vector<8x32xf32> to vector<8xf32>
    %11 = vector.shape_cast %10 : vector<8xf32> to vector<8x1xf32>
    %cst_7 = arith.constant 3.200000e+01 : f32
    %12 = vector.broadcast %cst_7 : f32 to vector<8x1xf32>
    %13 = arith.divf %11, %12 : vector<8x1xf32>
    %14 = vector.broadcast %6 : vector<8x1xf32> to vector<8x32xf32>
    %15 = arith.subf %0, %14 : vector<8x32xf32>
    %cst_8 = arith.constant 9.99999974E-6 : f32
    %16 = vector.broadcast %cst_8 : f32 to vector<8x1xf32>
    %17 = arith.addf %13, %16 : vector<8x1xf32>
    %18 = math.rsqrt %17 : vector<8x1xf32>
    %19 = vector.broadcast %18 : vector<8x1xf32> to vector<8x32xf32>
    %20 = arith.mulf %15, %19 : vector<8x32xf32>
    %21 = vector.broadcast %1 : vector<1x32xf32> to vector<8x32xf32>
    %22 = arith.mulf %20, %21 : vector<8x32xf32>
    %23 = vector.broadcast %2 : vector<1x32xf32> to vector<8x32xf32>
    %24 = arith.addf %22, %23 : vector<8x32xf32>
    %25 = arith.truncf %24 : vector<8x32xf32> to vector<8x32xbf16>
    %c0_9 = arith.constant 0 : index
    %c0_10 = arith.constant 0 : index
    %26 = vector.load %arg4[%c0_9, %c0_10] : memref<32x96xbf16, #tpu.memory_space<vmem>>, vector<32x96xbf16>
    %cst_11 = arith.constant dense<0.000000e+00> : vector<8x96xf32>
    %27 = tpu.matmul %25, %26, %cst_11 {dimension_numbers = #tpu.dot_dimension_numbers<[1], [0], [0], [1], [0, 0, 1, 1], [], []>} : vector<8x32xbf16>, vector<32x96xbf16>, vector<8x96xf32> -> vector<8x96xf32>
    %c0_12 = arith.constant 0 : index
    %c0_13 = arith.constant 0 : index
    %28 = vector.load %arg6[%c0_12, %c0_13] : memref<1x32xf32, #tpu.memory_space<vmem>>, vector<1x32xf32>
    %29 = vector.shape_cast %28 : vector<1x32xf32> to vector<1x32xf32>
    %30 = vector.broadcast %29 : vector<1x32xf32> to vector<8x32xf32>
    %31 = vector.extract_strided_slice %27 {offsets = [0, 0], sizes = [8, 8], strides = [1, 1]} : vector<8x96xf32> to vector<8x8xf32>
    %32 = arith.truncf %31 : vector<8x8xf32> to vector<8x8xbf16>
    %33 = vector.shape_cast %32 : vector<8x8xbf16> to vector<1x8x8xbf16>
    %34 = vector.extract_strided_slice %27 {offsets = [0, 32], sizes = [8, 8], strides = [1, 1]} : vector<8x96xf32> to vector<8x8xf32>
    %35 = arith.truncf %34 : vector<8x8xf32> to vector<8x8xbf16>
    %36 = vector.shape_cast %35 : vector<8x8xbf16> to vector<1x8x8xbf16>
    %37 = vector.extract_strided_slice %27 {offsets = [0, 64], sizes = [8, 8], strides = [1, 1]} : vector<8x96xf32> to vector<8x8xf32>
    %38 = arith.truncf %37 : vector<8x8xf32> to vector<8x8xbf16>
    %39 = vector.shape_cast %38 : vector<8x8xbf16> to vector<1x8x8xbf16>
    "tpu.trace_start"() <{level = 10 : i32, message = "bqd,bkd->bqk"}> : () -> ()
    %cst_14 = arith.constant dense<0.000000e+00> : vector<1x8x8xf32>
    %40 = tpu.matmul %33, %36, %cst_14 {dimension_numbers = #tpu.dot_dimension_numbers<[2], [2], [1], [1], [0, 0, 0, 1, 1, 1], [0], [0]>} : vector<1x8x8xbf16>, vector<1x8x8xbf16>, vector<1x8x8xf32> -> vector<1x8x8xf32>
    "tpu.trace_stop"() : () -> ()
    %cst_15 = arith.constant dense<0xFF800000> : vector<1x8xf32>
    %41 = vector.multi_reduction <maximumf>, %40, %cst_15 [2] : vector<1x8x8xf32> to vector<1x8xf32>
    %42 = vector.shape_cast %41 : vector<1x8xf32> to vector<1x8x1xf32>
    %43 = vector.broadcast %42 : vector<1x8x1xf32> to vector<1x8x8xf32>
    %44 = arith.subf %40, %43 : vector<1x8x8xf32>
    %45 = math.exp %44 : vector<1x8x8xf32>
    %cst_16 = arith.constant dense<0.000000e+00> : vector<1x8xf32>
    %46 = vector.multi_reduction <add>, %45, %cst_16 [2] : vector<1x8x8xf32> to vector<1x8xf32>
    %47 = vector.shape_cast %46 : vector<1x8xf32> to vector<1x8x1xf32>
    %48 = tpu.reciprocal %47 {approx = true} : vector<1x8x1xf32> -> vector<1x8x1xf32>
    %49 = vector.broadcast %48 : vector<1x8x1xf32> to vector<1x8x8xf32>
    %50 = arith.mulf %45, %49 : vector<1x8x8xf32>
    %51 = arith.truncf %50 : vector<1x8x8xf32> to vector<1x8x8xbf16>
    "tpu.trace_start"() <{level = 10 : i32, message = "bqk,bkd->bqd"}> : () -> ()
    %cst_17 = arith.constant dense<0.000000e+00> : vector<1x8x8xf32>
    %52 = tpu.matmul %51, %39, %cst_17 {dimension_numbers = #tpu.dot_dimension_numbers<[2], [1], [1], [2], [0, 0, 0, 1, 1, 2], [0], [0]>} : vector<1x8x8xbf16>, vector<1x8x8xbf16>, vector<1x8x8xf32> -> vector<1x8x8xf32>
    "tpu.trace_stop"() : () -> ()
    %53 = vector.shape_cast %52 : vector<1x8x8xf32> to vector<8x8xf32>
    %54 = arith.truncf %53 : vector<8x8xf32> to vector<8x8xbf16>
    %c0_18 = arith.constant 0 : index
    %c0_19 = arith.constant 0 : index
    %c0_20 = arith.constant 0 : index
    %55 = vector.load %arg5[%c0_18, %c0_19, %c0_20] : memref<4x8x32xbf16, #tpu.memory_space<vmem>>, vector<1x8x32xbf16>
    %56 = vector.shape_cast %55 : vector<1x8x32xbf16> to vector<8x32xbf16>
    %cst_21 = arith.constant dense<0.000000e+00> : vector<8x32xf32>
    %57 = tpu.matmul %54, %56, %cst_21 {dimension_numbers = #tpu.dot_dimension_numbers<[1], [0], [0], [1], [0, 0, 1, 1], [], []>} : vector<8x8xbf16>, vector<8x32xbf16>, vector<8x32xf32> -> vector<8x32xf32>
    %58 = arith.addf %30, %57 : vector<8x32xf32>
    %59 = vector.extract_strided_slice %27 {offsets = [0, 8], sizes = [8, 8], strides = [1, 1]} : vector<8x96xf32> to vector<8x8xf32>
    %60 = arith.truncf %59 : vector<8x8xf32> to vector<8x8xbf16>
    %61 = vector.shape_cast %60 : vector<8x8xbf16> to vector<1x8x8xbf16>
    %62 = vector.extract_strided_slice %27 {offsets = [0, 40], sizes = [8, 8], strides = [1, 1]} : vector<8x96xf32> to vector<8x8xf32>
    %63 = arith.truncf %62 : vector<8x8xf32> to vector<8x8xbf16>
    %64 = vector.shape_cast %63 : vector<8x8xbf16> to vector<1x8x8xbf16>
    %65 = vector.extract_strided_slice %27 {offsets = [0, 72], sizes = [8, 8], strides = [1, 1]} : vector<8x96xf32> to vector<8x8xf32>
    %66 = arith.truncf %65 : vector<8x8xf32> to vector<8x8xbf16>
    %67 = vector.shape_cast %66 : vector<8x8xbf16> to vector<1x8x8xbf16>
    "tpu.trace_start"() <{level = 10 : i32, message = "bqd,bkd->bqk"}> : () -> ()
    %cst_22 = arith.constant dense<0.000000e+00> : vector<1x8x8xf32>
    %68 = tpu.matmul %61, %64, %cst_22 {dimension_numbers = #tpu.dot_dimension_numbers<[2], [2], [1], [1], [0, 0, 0, 1, 1, 1], [0], [0]>} : vector<1x8x8xbf16>, vector<1x8x8xbf16>, vector<1x8x8xf32> -> vector<1x8x8xf32>
    "tpu.trace_stop"() : () -> ()
    %cst_23 = arith.constant dense<0xFF800000> : vector<1x8xf32>
    %69 = vector.multi_reduction <maximumf>, %68, %cst_23 [2] : vector<1x8x8xf32> to vector<1x8xf32>
    %70 = vector.shape_cast %69 : vector<1x8xf32> to vector<1x8x1xf32>
    %71 = vector.broadcast %70 : vector<1x8x1xf32> to vector<1x8x8xf32>
    %72 = arith.subf %68, %71 : vector<1x8x8xf32>
    %73 = math.exp %72 : vector<1x8x8xf32>
    %cst_24 = arith.constant dense<0.000000e+00> : vector<1x8xf32>
    %74 = vector.multi_reduction <add>, %73, %cst_24 [2] : vector<1x8x8xf32> to vector<1x8xf32>
    %75 = vector.shape_cast %74 : vector<1x8xf32> to vector<1x8x1xf32>
    %76 = tpu.reciprocal %75 {approx = true} : vector<1x8x1xf32> -> vector<1x8x1xf32>
    %77 = vector.broadcast %76 : vector<1x8x1xf32> to vector<1x8x8xf32>
    %78 = arith.mulf %73, %77 : vector<1x8x8xf32>
    %79 = arith.truncf %78 : vector<1x8x8xf32> to vector<1x8x8xbf16>
    "tpu.trace_start"() <{level = 10 : i32, message = "bqk,bkd->bqd"}> : () -> ()
    %cst_25 = arith.constant dense<0.000000e+00> : vector<1x8x8xf32>
    %80 = tpu.matmul %79, %67, %cst_25 {dimension_numbers = #tpu.dot_dimension_numbers<[2], [1], [1], [2], [0, 0, 0, 1, 1, 2], [0], [0]>} : vector<1x8x8xbf16>, vector<1x8x8xbf16>, vector<1x8x8xf32> -> vector<1x8x8xf32>
    "tpu.trace_stop"() : () -> ()
    %81 = vector.shape_cast %80 : vector<1x8x8xf32> to vector<8x8xf32>
    %82 = arith.truncf %81 : vector<8x8xf32> to vector<8x8xbf16>
    %c1 = arith.constant 1 : index
    %c0_26 = arith.constant 0 : index
    %c0_27 = arith.constant 0 : index
    %83 = vector.load %arg5[%c1, %c0_26, %c0_27] : memref<4x8x32xbf16, #tpu.memory_space<vmem>>, vector<1x8x32xbf16>
    %84 = vector.shape_cast %83 : vector<1x8x32xbf16> to vector<8x32xbf16>
    %cst_28 = arith.constant dense<0.000000e+00> : vector<8x32xf32>
    %85 = tpu.matmul %82, %84, %cst_28 {dimension_numbers = #tpu.dot_dimension_numbers<[1], [0], [0], [1], [0, 0, 1, 1], [], []>} : vector<8x8xbf16>, vector<8x32xbf16>, vector<8x32xf32> -> vector<8x32xf32>
    %86 = arith.addf %58, %85 : vector<8x32xf32>
    %87 = vector.extract_strided_slice %27 {offsets = [0, 16], sizes = [8, 8], strides = [1, 1]} : vector<8x96xf32> to vector<8x8xf32>
    %88 = arith.truncf %87 : vector<8x8xf32> to vector<8x8xbf16>
    %89 = vector.shape_cast %88 : vector<8x8xbf16> to vector<1x8x8xbf16>
    %90 = vector.extract_strided_slice %27 {offsets = [0, 48], sizes = [8, 8], strides = [1, 1]} : vector<8x96xf32> to vector<8x8xf32>
    %91 = arith.truncf %90 : vector<8x8xf32> to vector<8x8xbf16>
    %92 = vector.shape_cast %91 : vector<8x8xbf16> to vector<1x8x8xbf16>
    %93 = vector.extract_strided_slice %27 {offsets = [0, 80], sizes = [8, 8], strides = [1, 1]} : vector<8x96xf32> to vector<8x8xf32>
    %94 = arith.truncf %93 : vector<8x8xf32> to vector<8x8xbf16>
    %95 = vector.shape_cast %94 : vector<8x8xbf16> to vector<1x8x8xbf16>
    "tpu.trace_start"() <{level = 10 : i32, message = "bqd,bkd->bqk"}> : () -> ()
    %cst_29 = arith.constant dense<0.000000e+00> : vector<1x8x8xf32>
    %96 = tpu.matmul %89, %92, %cst_29 {dimension_numbers = #tpu.dot_dimension_numbers<[2], [2], [1], [1], [0, 0, 0, 1, 1, 1], [0], [0]>} : vector<1x8x8xbf16>, vector<1x8x8xbf16>, vector<1x8x8xf32> -> vector<1x8x8xf32>
    "tpu.trace_stop"() : () -> ()
    %cst_30 = arith.constant dense<0xFF800000> : vector<1x8xf32>
    %97 = vector.multi_reduction <maximumf>, %96, %cst_30 [2] : vector<1x8x8xf32> to vector<1x8xf32>
    %98 = vector.shape_cast %97 : vector<1x8xf32> to vector<1x8x1xf32>
    %99 = vector.broadcast %98 : vector<1x8x1xf32> to vector<1x8x8xf32>
    %100 = arith.subf %96, %99 : vector<1x8x8xf32>
    %101 = math.exp %100 : vector<1x8x8xf32>
    %cst_31 = arith.constant dense<0.000000e+00> : vector<1x8xf32>
    %102 = vector.multi_reduction <add>, %101, %cst_31 [2] : vector<1x8x8xf32> to vector<1x8xf32>
    %103 = vector.shape_cast %102 : vector<1x8xf32> to vector<1x8x1xf32>
    %104 = tpu.reciprocal %103 {approx = true} : vector<1x8x1xf32> -> vector<1x8x1xf32>
    %105 = vector.broadcast %104 : vector<1x8x1xf32> to vector<1x8x8xf32>
    %106 = arith.mulf %101, %105 : vector<1x8x8xf32>
    %107 = arith.truncf %106 : vector<1x8x8xf32> to vector<1x8x8xbf16>
    "tpu.trace_start"() <{level = 10 : i32, message = "bqk,bkd->bqd"}> : () -> ()
    %cst_32 = arith.constant dense<0.000000e+00> : vector<1x8x8xf32>
    %108 = tpu.matmul %107, %95, %cst_32 {dimension_numbers = #tpu.dot_dimension_numbers<[2], [1], [1], [2], [0, 0, 0, 1, 1, 2], [0], [0]>} : vector<1x8x8xbf16>, vector<1x8x8xbf16>, vector<1x8x8xf32> -> vector<1x8x8xf32>
    "tpu.trace_stop"() : () -> ()
    %109 = vector.shape_cast %108 : vector<1x8x8xf32> to vector<8x8xf32>
    %110 = arith.truncf %109 : vector<8x8xf32> to vector<8x8xbf16>
    %c2 = arith.constant 2 : index
    %c0_33 = arith.constant 0 : index
    %c0_34 = arith.constant 0 : index
    %111 = vector.load %arg5[%c2, %c0_33, %c0_34] : memref<4x8x32xbf16, #tpu.memory_space<vmem>>, vector<1x8x32xbf16>
    %112 = vector.shape_cast %111 : vector<1x8x32xbf16> to vector<8x32xbf16>
    %cst_35 = arith.constant dense<0.000000e+00> : vector<8x32xf32>
    %113 = tpu.matmul %110, %112, %cst_35 {dimension_numbers = #tpu.dot_dimension_numbers<[1], [0], [0], [1], [0, 0, 1, 1], [], []>} : vector<8x8xbf16>, vector<8x32xbf16>, vector<8x32xf32> -> vector<8x32xf32>
    %114 = arith.addf %86, %113 : vector<8x32xf32>
    %115 = vector.extract_strided_slice %27 {offsets = [0, 24], sizes = [8, 8], strides = [1, 1]} : vector<8x96xf32> to vector<8x8xf32>
    %116 = arith.truncf %115 : vector<8x8xf32> to vector<8x8xbf16>
    %117 = vector.shape_cast %116 : vector<8x8xbf16> to vector<1x8x8xbf16>
    %118 = vector.extract_strided_slice %27 {offsets = [0, 56], sizes = [8, 8], strides = [1, 1]} : vector<8x96xf32> to vector<8x8xf32>
    %119 = arith.truncf %118 : vector<8x8xf32> to vector<8x8xbf16>
    %120 = vector.shape_cast %119 : vector<8x8xbf16> to vector<1x8x8xbf16>
    %121 = vector.extract_strided_slice %27 {offsets = [0, 88], sizes = [8, 8], strides = [1, 1]} : vector<8x96xf32> to vector<8x8xf32>
    %122 = arith.truncf %121 : vector<8x8xf32> to vector<8x8xbf16>
    %123 = vector.shape_cast %122 : vector<8x8xbf16> to vector<1x8x8xbf16>
    "tpu.trace_start"() <{level = 10 : i32, message = "bqd,bkd->bqk"}> : () -> ()
    %cst_36 = arith.constant dense<0.000000e+00> : vector<1x8x8xf32>
    %124 = tpu.matmul %117, %120, %cst_36 {dimension_numbers = #tpu.dot_dimension_numbers<[2], [2], [1], [1], [0, 0, 0, 1, 1, 1], [0], [0]>} : vector<1x8x8xbf16>, vector<1x8x8xbf16>, vector<1x8x8xf32> -> vector<1x8x8xf32>
    "tpu.trace_stop"() : () -> ()
    %cst_37 = arith.constant dense<0xFF800000> : vector<1x8xf32>
    %125 = vector.multi_reduction <maximumf>, %124, %cst_37 [2] : vector<1x8x8xf32> to vector<1x8xf32>
    %126 = vector.shape_cast %125 : vector<1x8xf32> to vector<1x8x1xf32>
    %127 = vector.broadcast %126 : vector<1x8x1xf32> to vector<1x8x8xf32>
    %128 = arith.subf %124, %127 : vector<1x8x8xf32>
    %129 = math.exp %128 : vector<1x8x8xf32>
    %cst_38 = arith.constant dense<0.000000e+00> : vector<1x8xf32>
    %130 = vector.multi_reduction <add>, %129, %cst_38 [2] : vector<1x8x8xf32> to vector<1x8xf32>
    %131 = vector.shape_cast %130 : vector<1x8xf32> to vector<1x8x1xf32>
    %132 = tpu.reciprocal %131 {approx = true} : vector<1x8x1xf32> -> vector<1x8x1xf32>
    %133 = vector.broadcast %132 : vector<1x8x1xf32> to vector<1x8x8xf32>
    %134 = arith.mulf %129, %133 : vector<1x8x8xf32>
    %135 = arith.truncf %134 : vector<1x8x8xf32> to vector<1x8x8xbf16>
    "tpu.trace_start"() <{level = 10 : i32, message = "bqk,bkd->bqd"}> : () -> ()
    %cst_39 = arith.constant dense<0.000000e+00> : vector<1x8x8xf32>
    %136 = tpu.matmul %135, %123, %cst_39 {dimension_numbers = #tpu.dot_dimension_numbers<[2], [1], [1], [2], [0, 0, 0, 1, 1, 2], [0], [0]>} : vector<1x8x8xbf16>, vector<1x8x8xbf16>, vector<1x8x8xf32> -> vector<1x8x8xf32>
    "tpu.trace_stop"() : () -> ()
    %137 = vector.shape_cast %136 : vector<1x8x8xf32> to vector<8x8xf32>
    %138 = arith.truncf %137 : vector<8x8xf32> to vector<8x8xbf16>
    %c3 = arith.constant 3 : index
    %c0_40 = arith.constant 0 : index
    %c0_41 = arith.constant 0 : index
    %139 = vector.load %arg5[%c3, %c0_40, %c0_41] : memref<4x8x32xbf16, #tpu.memory_space<vmem>>, vector<1x8x32xbf16>
    %140 = vector.shape_cast %139 : vector<1x8x32xbf16> to vector<8x32xbf16>
    %cst_42 = arith.constant dense<0.000000e+00> : vector<8x32xf32>
    %141 = tpu.matmul %138, %140, %cst_42 {dimension_numbers = #tpu.dot_dimension_numbers<[1], [0], [0], [1], [0, 0, 1, 1], [], []>} : vector<8x8xbf16>, vector<8x32xbf16>, vector<8x32xf32> -> vector<8x32xf32>
    %142 = arith.addf %114, %141 : vector<8x32xf32>
    %143 = arith.addf %0, %142 : vector<8x32xf32>
    %c0_43 = arith.constant 0 : index
    %c0_44 = arith.constant 0 : index
    %144 = vector.load %arg7[%c0_43, %c0_44] : memref<1x32xf32, #tpu.memory_space<vmem>>, vector<1x32xf32>
    %c0_45 = arith.constant 0 : index
    %c0_46 = arith.constant 0 : index
    %145 = vector.load %arg8[%c0_45, %c0_46] : memref<1x32xf32, #tpu.memory_space<vmem>>, vector<1x32xf32>
    %cst_47 = arith.constant dense<0.000000e+00> : vector<8xf32>
    %146 = vector.multi_reduction <add>, %143, %cst_47 [1] : vector<8x32xf32> to vector<8xf32>
    %147 = vector.shape_cast %146 : vector<8xf32> to vector<8x1xf32>
    %cst_48 = arith.constant 3.200000e+01 : f32
    %148 = vector.broadcast %cst_48 : f32 to vector<8x1xf32>
    %149 = arith.divf %147, %148 : vector<8x1xf32>
    %150 = vector.broadcast %149 : vector<8x1xf32> to vector<8x32xf32>
    %151 = arith.subf %143, %150 : vector<8x32xf32>
    %152 = arith.mulf %151, %151 : vector<8x32xf32>
    %cst_49 = arith.constant dense<0.000000e+00> : vector<8xf32>
    %153 = vector.multi_reduction <add>, %152, %cst_49 [1] : vector<8x32xf32> to vector<8xf32>
    %154 = vector.shape_cast %153 : vector<8xf32> to vector<8x1xf32>
    %cst_50 = arith.constant 3.200000e+01 : f32
    %155 = vector.broadcast %cst_50 : f32 to vector<8x1xf32>
    %156 = arith.divf %154, %155 : vector<8x1xf32>
    %157 = vector.broadcast %149 : vector<8x1xf32> to vector<8x32xf32>
    %158 = arith.subf %143, %157 : vector<8x32xf32>
    %cst_51 = arith.constant 9.99999974E-6 : f32
    %159 = vector.broadcast %cst_51 : f32 to vector<8x1xf32>
    %160 = arith.addf %156, %159 : vector<8x1xf32>
    %161 = math.rsqrt %160 : vector<8x1xf32>
    %162 = vector.broadcast %161 : vector<8x1xf32> to vector<8x32xf32>
    %163 = arith.mulf %158, %162 : vector<8x32xf32>
    %164 = vector.broadcast %144 : vector<1x32xf32> to vector<8x32xf32>
    %165 = arith.mulf %163, %164 : vector<8x32xf32>
    %166 = vector.broadcast %145 : vector<1x32xf32> to vector<8x32xf32>
    %167 = arith.addf %165, %166 : vector<8x32xf32>
    %168 = arith.truncf %167 : vector<8x32xf32> to vector<8x32xbf16>
    %c0_52 = arith.constant 0 : index
    %c0_53 = arith.constant 0 : index
    %169 = vector.load %arg9[%c0_52, %c0_53] : memref<32x128xbf16, #tpu.memory_space<vmem>>, vector<32x128xbf16>
    %cst_54 = arith.constant dense<0.000000e+00> : vector<8x128xf32>
    %170 = tpu.matmul %168, %169, %cst_54 {dimension_numbers = #tpu.dot_dimension_numbers<[1], [0], [0], [1], [0, 0, 1, 1], [], []>} : vector<8x32xbf16>, vector<32x128xbf16>, vector<8x128xf32> -> vector<8x128xf32>
    %c0_55 = arith.constant 0 : index
    %c0_56 = arith.constant 0 : index
    %171 = vector.load %arg10[%c0_55, %c0_56] : memref<1x128xf32, #tpu.memory_space<vmem>>, vector<1x128xf32>
    %172 = vector.broadcast %171 : vector<1x128xf32> to vector<8x128xf32>
    %173 = arith.addf %170, %172 : vector<8x128xf32>
    %cst_57 = arith.constant 5.000000e-01 : f32
    %174 = vector.broadcast %cst_57 : f32 to vector<8x128xf32>
    %175 = arith.mulf %174, %173 : vector<8x128xf32>
    %cst_58 = arith.constant 0.707106769 : f32
    %176 = vector.broadcast %cst_58 : f32 to vector<8x128xf32>
    %177 = arith.mulf %173, %176 : vector<8x128xf32>
    %178 = math.erf %177 : vector<8x128xf32>
    %cst_59 = arith.constant 1.000000e+00 : f32
    %179 = vector.broadcast %cst_59 : f32 to vector<8x128xf32>
    %180 = arith.addf %179, %178 : vector<8x128xf32>
    %181 = arith.mulf %175, %180 : vector<8x128xf32>
    %182 = arith.truncf %181 : vector<8x128xf32> to vector<8x128xbf16>
    %c0_60 = arith.constant 0 : index
    %c0_61 = arith.constant 0 : index
    %183 = vector.load %arg11[%c0_60, %c0_61] : memref<128x32xbf16, #tpu.memory_space<vmem>>, vector<128x32xbf16>
    %cst_62 = arith.constant dense<0.000000e+00> : vector<8x32xf32>
    %184 = tpu.matmul %182, %183, %cst_62 {dimension_numbers = #tpu.dot_dimension_numbers<[1], [0], [0], [1], [0, 0, 1, 1], [], []>} : vector<8x128xbf16>, vector<128x32xbf16>, vector<8x32xf32> -> vector<8x32xf32>
    %c0_63 = arith.constant 0 : index
    %c0_64 = arith.constant 0 : index
    %185 = vector.load %arg12[%c0_63, %c0_64] : memref<1x32xf32, #tpu.memory_space<vmem>>, vector<1x32xf32>
    %186 = vector.broadcast %185 : vector<1x32xf32> to vector<8x32xf32>
    %187 = arith.addf %184, %186 : vector<8x32xf32>
    %188 = arith.addf %143, %187 : vector<8x32xf32>
    %c0_65 = arith.constant 0 : index
    %c0_66 = arith.constant 0 : index
    %189 = vector.load %arg13[%c0_65, %c0_66] : memref<8x32xf32, #tpu.memory_space<vmem>>, vector<8x32xf32>
    tpu.vector_store %arg13[%c0_65, %c0_66], %188 {strides = array<i32>} : memref<8x32xf32, #tpu.memory_space<vmem>>, vector<8x32xf32>,
    return
  }
  func.func @transform_0(%arg0: i32) -> (i32, i32) {
    %c0_i32 = arith.constant 0 : i32
    %c0_i32_0 = arith.constant 0 : i32
    return %arg0, %c0_i32 : i32, i32
  }
  func.func @transform_1(%arg0: i32) -> (i32, i32) {
    %c0_i32 = arith.constant 0 : i32
    %c0_i32_0 = arith.constant 0 : i32
    %c0_i32_1 = arith.constant 0 : i32
    return %c0_i32, %c0_i32_0 : i32, i32
  }
  func.func @transform_2(%arg0: i32) -> (i32, i32) {
    %c0_i32 = arith.constant 0 : i32
    %c0_i32_0 = arith.constant 0 : i32
    %c0_i32_1 = arith.constant 0 : i32
    return %c0_i32, %c0_i32_0 : i32, i32
  }
  func.func @transform_3(%arg0: i32) -> (i32, i32) {
    %c0_i32 = arith.constant 0 : i32
    %c0_i32_0 = arith.constant 0 : i32
    %c0_i32_1 = arith.constant 0 : i32
    return %c0_i32, %c0_i32_0 : i32, i32
  }
  func.func @transform_4(%arg0: i32) -> (i32, i32, i32) {
    %c0_i32 = arith.constant 0 : i32
    %c0_i32_0 = arith.constant 0 : i32
    %c0_i32_1 = arith.constant 0 : i32
    %c0_i32_2 = arith.constant 0 : i32
    return %c0_i32, %c0_i32_0, %c0_i32_1 : i32, i32, i32
  }
  func.func @transform_5(%arg0: i32) -> (i32, i32) {
    %c0_i32 = arith.constant 0 : i32
    %c0_i32_0 = arith.constant 0 : i32
    %c0_i32_1 = arith.constant 0 : i32
    return %c0_i32, %c0_i32_0 : i32, i32
  }
  func.func @transform_6(%arg0: i32) -> (i32, i32) {
    %c0_i32 = arith.constant 0 : i32
    %c0_i32_0 = arith.constant 0 : i32
    %c0_i32_1 = arith.constant 0 : i32
    return %c0_i32, %c0_i32_0 : i32, i32
  }
  func.func @transform_7(%arg0: i32) -> (i32, i32) {
    %c0_i32 = arith.constant 0 : i32
    %c0_i32_0 = arith.constant 0 : i32
    %c0_i32_1 = arith.constant 0 : i32
    return %c0_i32, %c0_i32_0 : i32, i32
  }
  func.func @transform_8(%arg0: i32) -> (i32, i32) {
    %c0_i32 = arith.constant 0 : i32
    %c0_i32_0 = arith.constant 0 : i32
    %c0_i32_1 = arith.constant 0 : i32
    return %c0_i32, %c0_i32_0 : i32, i32
  }
  func.func @transform_9(%arg0: i32) -> (i32, i32) {
    %c0_i32 = arith.constant 0 : i32
    %c0_i32_0 = arith.constant 0 : i32
    %c0_i32_1 = arith.constant 0 : i32
    return %c0_i32, %c0_i32_0 : i32, i32
  }
  func.func @transform_10(%arg0: i32) -> (i32, i32) {
    %c0_i32 = arith.constant 0 : i32
    %c0_i32_0 = arith.constant 0 : i32
    %c0_i32_1 = arith.constant 0 : i32
    return %c0_i32, %c0_i32_0 : i32, i32
  }
  func.func @transform_11(%arg0: i32) -> (i32, i32) {
    %c0_i32 = arith.constant 0 : i32
    %c0_i32_0 = arith.constant 0 : i32
    %c0_i32_1 = arith.constant 0 : i32
    return %c0_i32, %c0_i32_0 : i32, i32
  }
  func.func @transform_12(%arg0: i32) -> (i32, i32) {
    %c0_i32 = arith.constant 0 : i32
    %c0_i32_0 = arith.constant 0 : i32
    return %arg0, %c0_i32 : i32, i32
  }
}

</mosaic_0001>

<bundles_post_ra>
// kernel: tpu_custom_call.1
= control target key start
LH: loop header
LB: loop body
LE: loop exit
PB: predicated region body
PF: predicated region fallthrough
CT: control target
= control target key end

     0   :  { %s1613_s0 = inlined_call_operand.vmem [shape: f32[16,32], index: 0, kind: input, shape index: {}]   ;;  %s1614_s1 = inlined_call_operand.vmem [shape: f32[1,32], index: 1, kind: input, shape index: {}]   ;;  %s1615_s2 = inlined_call_operand.vmem [shape: f32[1,32], index: 2, kind: input, shape index: {}]   ;;  %s1616_s3 = inlined_call_operand.vmem [shape: bf16[32,96], index: 3, kind: input, shape index: {}]   ;;  %s1617_s4 = inlined_call_operand.vmem [shape: bf16[4,8,32], index: 4, kind: input, shape index: {}]   ;;  %s1618_s5 = inlined_call_operand.vmem [shape: f32[1,32], index: 5, kind: input, shape index: {}]   ;;  %s1619_s6 = inlined_call_operand.vmem [shape: f32[1,32], index: 6, kind: input, shape index: {}]   ;;  %s1620_s7 = inlined_call_operand.vmem [shape: f32[1,32], index: 7, kind: input, shape index: {}]   ;;  %s1621_s8 = inlined_call_operand.vmem [shape: bf16[32,128], index: 8, kind: input, shape index: {}]   ;;  %s1622_s9 = inlined_call_operand.vmem [shape: f32[1,128], index: 9, kind: input, shape index: {}]   ;;  %s1623_s10 = inlined_call_operand.vmem [shape: bf16[128,32], index: 10, kind: input, shape index: {}]   ;;  %s1624_s11 = inlined_call_operand.vmem [shape: f32[1,32], index: 11, kind: input, shape index: {}]   ;;  %s1625_s12 = inlined_call_operand.hbm [shape: f32[16,32], index: 12, kind: output, shape index: {}]  }
   0x1   :  { %1626 = sst [smem:[#allocation5_spill]] %s1613_s0 }
   0x2   :  { %1627 = sst [smem:[#allocation6_spill]] %s1614_s1 }
   0x3   :  { %1628 = sst [smem:[#allocation7_spill]] %s1615_s2 }
   0x4   :  { %17 = vsyncpa [#allocation3], 0 }
   0x5   :  { %19 = vsyncpa [#allocation3 + $0x1], 0  ;;  %s1391_s21 = smov 0   ;;  %s1393_s22 = smov 0  }
   0x6   :  { %s1395_s23 = smov 0   ;;  %s1397_s24 = smov 0  }
   0x7 LB: > { %s1412_s25 = sadd.s32 4294967295, %s1312_s24   ;;  %s1080_s26 = sadd.s32 4294967294, %s1312_s24   ;;  %s1312_s24 = sphi %s1397_s24, %s1637_s24   ;;  %s1308_s23 = sphi %s1395_s23, %s1636_s23   ;;  %s1304_s22 = sphi %s1393_s22, %s1635_s22   ;;  %s1300_s21 = sphi %s1391_s21, %s1634_s21  }
   0x8   : > { %s1416_s27 = sadd.s32 1, %s1312_s24   ;;  %s289_s28 = sadd.s32 1, %s1308_s23 }
   0x9   : > { %s286_s29 = ssub.s32 %s1312_s24, %s1416_s27  ;;  %p299_p0 = scmp.ne.s32.totalorder %s1308_s23, %s1304_s22 }
   0xa   : > { %p287_p1 = scmp.eq.s32.totalorder %s286_s29, 0  ;;  %p300_p2 = scmp.eq.s32.totalorder %s1412_s25, 1 }
   0xb   : > { %p305_p3 = scmp.ne.s32.totalorder %s1304_s22, %s1300_s21  ;;  %p306_p4 = scmp.eq.s32.totalorder %s1080_s26, 1 }
   0xc   : > { %s1427_s30 = scalar_select %p287_p1, %s1308_s23, %s289_s28  }
   0xd   : > { %p1429_p5 = por %p300_p2, %p299_p0  ;;  %p1433_p6 = por %p306_p4, %p305_p3 }
   0xe   : > { %p1083_p7 = scmp.ge.s32.totalorder %s1312_s24, 1  ;;  %p364_p8 = scmp.lt.s32.totalorder %s1312_s24, 3 }
  0x10   : > { %p365_p9 = pnand %p1083_p7, %p364_p8 }
  0x11   : > { %p405_p10 = scmp.lt.s32.totalorder (!%p365_p9), %s1412_s25, 1  ;;  %s1631_s0 = sld [smem:[#allocation5_spill]] (!%p365_p9) }
  0x12   : > { %368 = sbr.rel (%p365_p9) target bundleno = 2727 (0xaa7), region = 68  ;;  %s1632_s1 = sld [smem:[#allocation6_spill]] (!%p365_p9) }
  0x13   : > { %s1633_s2 = sld [smem:[#allocation7_spill]] (!%p365_p9)  ;;  %s1316_s20 = smov (!%p365_p9), 64  }
  0x14   : > { %s1317_s26 = smov (!%p365_p9), 96   ;;  %s1318_s28 = smov (!%p365_p9), 56  }
  0x15   : > { %s1319_s29 = smov (!%p365_p9), 80   ;;  %s1321_s18 = smov (!%p365_p9), 120  }
  0x17   : > { %s406_s15 = scalar_select %p405_p10, %s1412_s25, 1  ;;  %vm413_vm0 = vcmask 261120   ;;  %v1314_v2 = vmov 32.0   ;;  %v1157_v14 = vld [vmem:[%s1616_s3 + $0x8] sm:$0xff]  ;;  %v1156_v15 = vld [vmem:[%s1616_s3] sm:$0xff]  ;;  %vm531_vm5 = vcmask 1043456  }
  0x18   : > { %1226 = vrcp.f32 %v1314_v2  ;;  %477 = vmatpush.bf16.msra.mxu1 %v1157_v14  ;;  %v1219_v25 = vld [vmem:[%s1632_s1] ss:$0 sm:$0xff]  ;;  %vm494_vm6 = vcmask 64512   ;;  %v1100_v14 = vld [vmem:[%s1617_s4 + $0x4] sm:$0xf] }
  0x19   : > { %s1085_s16 = sshll.u32 %s406_s15, 3  ;;  %v1220_v28 = vld [vmem:[%s1633_s2] ss:$0 sm:$0xff]  ;;  %s1320_s15 = smov 104  }
  0x1a   : > { %s408_s19 = scalar_lea.vmem %s1631_s0, %s1085_s16  ;;  %v549_v46 = vld [vmem:[%s1617_s4] sm:$0xf] }
  0x1b   : > { %v1444_v0 = vld [vmem:[%s408_s19] sm:$0xff]  ;;  %s1315_s19 = smov 88   ;;  %v554_v47 = vsel %vm531_vm5, %v549_v46, 0 }
  0x1c   : > { %v414_v1 = vsel %vm413_vm0, %v1444_v0, 0.0  ;;  %478 = vmatpush.bf16.msra.mxu1 %v1156_v15  ;;  %563 = vmatpush.bf16.msra.mxu3 %v554_v47  ;;  %v633_v15 = vsel %vm531_vm5, %v1100_v14, 0 }
  0x1d   : > { %415 = vadd.xlane.f32.xlu0 %v414_v1  ;;  %642 = vmatpush.bf16.msra.mxu0 %v633_v15 }
  0x1e   : > { %v1227_v3 = vpop.eup %1226 }
  0x1f   : > { %v418_v4 = vmul.f32 32.0, %v1227_v3  ;;  %vm422_vm1 = vweird.f32 %v1227_v3 }
  0x21   : > { %v419_v5 = vsub.f32 1.0, %v418_v4 }
  0x23   : > { %v420_v6 = vmul.f32 %v1227_v3, %v419_v5 }
  0x25   : > { %v421_v7 = vadd.f32 %v1227_v3, %v420_v6 }
  0x27   : > { %v1448_v8 = vsel %vm422_vm1, %v1227_v3, %v421_v7 }
  0x90   : > { %v416_v9 = vpop.xlane.xlu0 %415 }
  0x91   : > { %v424_v10 = vmul.f32 %v1448_v8, %v416_v9 }
  0x93   : > { %v425_v11 = vsub.f32 %v1444_v0, %v424_v10 }
  0x95   : > { %v426_v12 = vmul.f32 %v425_v11, %v425_v11 }
  0x97   : > { %v427_v13 = vsel %vm413_vm0, %v426_v12, 0.0 }
  0x98   : > { %428 = vadd.xlane.f32.xlu0 %v427_v13 }
 0x10b   : > { %v429_v16 = vpop.xlane.xlu0 %428 }
 0x10c   : > { %v430_v17 = vmul.f32 %v429_v16, %v1448_v8 }
 0x10e   : > { %v431_v18 = vadd.f32 1e-05, %v430_v17 }
 0x110   : > { %1228 = vrsqrt.f32 %v431_v18  ;;  %vm438_vm3 = vweird.f32 %v431_v18 }
 0x116   : > { %v1229_v19 = vpop.eup %1228 }
 0x117   : > { %v433_v20 = vmul.f32 %v1229_v19, %v431_v18  ;;  %vm439_vm2 = vweird.f32 %v1229_v19 }
 0x118   : > { %vm440_vm4 = vmor %vm438_vm3, %vm439_vm2 }
 0x119   : > { %v434_v21 = vmul.f32 %v1229_v19, %v433_v20 }
 0x11b   : > { %v435_v22 = vmul.f32 0.5, %v434_v21 }
 0x11d   : > { %v436_v23 = vsub.f32 1.5, %v435_v22 }
 0x11f   : > { %v437_v24 = vmul.f32 %v1229_v19, %v436_v23 }
 0x121   : > { %v441_v26 = vsel %vm440_vm4, %v1229_v19, %v437_v24 }
 0x122   : > { %v442_v27 = vmul.f32 %v441_v26, %v425_v11 }
 0x124   : > { %v446_v29 = vmul.f32 %v1219_v25, %v442_v27 }
 0x126   : > { %v450_v30 = vadd.f32 %v1220_v28, %v446_v29 }
 0x128   : > { %v451_v31 = vpack.c.bf16 %v450_v30, %v450_v30 }
 0x12a   : > { %1094 = vmatmul.msk.bf16.vlgmr.msra.gmra.mxu1 %vm413_vm0, %v451_v31 }
 0x1a7   : > { %v480_v32 = vpop.f32.mrf.mxu1 }
 0x1a8   : > { %v488_v33 = vpack.c.bf16 %v480_v32, %v480_v32 }
 0x1aa   : > { %v490_v34 = vunpack.c.l.b16 %v488_v33 }
 0x1ac   : > { %v1467_v35 = vpack.c.b16 %v490_v34, %v490_v34 }
 0x1ae   : > { %572 = vrot.lane.b32.xlu0 %v1467_v35, %s1315_s19  ;;  %526 = vrot.lane.b32.xlu2 %v1467_v35, %s1316_s20  ;;  %s1322_s19 = smov 112   ;;  %s1323_s20 = smov 72  }
 0x1af   : > { %492 = vrot.lane.b32.xlu1 %v1467_v35, %s1317_s26  ;;  %v482_v36 = vpop.f32.mrf.mxu1  ;;  %s402_s26 = sand.u32 1, %s1304_s22  }
 0x208   : > { %v527_v37 = vpop.permute.xlu2 %526 }
 0x209   : > { %v533_v38 = vsel %vm531_vm5, %v527_v37, 0 }
 0x20a   : > { %542 = vmatpush.bf16.msra.mxu2 %v533_v38  ;;  %v1221_v38 = vld [vmem:[%s1618_s5] ss:$0 sm:$0xff] }
 0x220   : > { %v573_v39 = vpop.permute.xlu0 %572 }
 0x221   : > { %v493_v40 = vpop.permute.xlu1 %492  ;;  %v578_v41 = vsel %vm494_vm6, %v573_v39, 0 }
 0x222   : > { %v499_v42 = vsel %vm494_vm6, %v493_v40, 0  ;;  %587 = vmatpush.bf16.xpose.msrb.mxu2 %v578_v41 }
 0x223   : > { %508 = vmatpush.bf16.xpose.msrb.mxu1 %v499_v42 }
 0x22a   : > { %1095 = vmatmul.msk.bf16.vlgmr.msrb.gmra.mxu1 %vm494_vm6, %v488_v33 }
 0x2a7   : > { %v510_v43 = vpop.f32.mrf.mxu1 }
 0x2a8   : > { %v514_v44 = vsel %vm494_vm6, %v510_v43, -inf }
 0x2a9   : > { %515 = vmax.xlane.f32.xlu1 %v514_v44 }
 0x2af   : > { %v512_v45 = vpop.f32.mrf.mxu1 }
 0x2c2   : > { %605 = vrot.lane.b32.xlu1 %v1467_v35, %s1318_s28  ;;  %s1084_s28 = sshll.u32 %s402_s26, 3 }
 0x2ca   : > { %651 = vrot.lane.b32.xlu1 %v1467_v35, %s1319_s29  ;;  %s1324_s29 = smov 48  }
 0x2d2   : > { %728 = vrot.lane.b32.xlu1 %v1467_v35, %s1320_s15  ;;  %s1325_s15 = smov 40  }
 0x31c   : > { %v516_v48 = vpop.xlane.xlu1 %515 }
 0x31d   : > { %v517_v49 = vsub.f32 %v510_v43, %v516_v48 }
 0x31f   : > { %v518_v50 = vmul.f32 1.442695, %v517_v49 }
 0x321   : > { %1230 = vpow2.f32 %v518_v50  ;;  %v1104_v50 = vld [vmem:[%s1617_s4 + $0x8] sm:$0xf] }
 0x327   : > { %v1231_v51 = vpop.eup %1230 }
 0x328   : > { %v520_v52 = vsel %vm494_vm6, %v1231_v51, 0.0 }
 0x329   : > { %521 = vadd.xlane.f32.xlu2 %v520_v52 }
 0x334   : > { %v606_v53 = vpop.permute.xlu1 %605 }
 0x335   : > { %v611_v54 = vsel %vm531_vm5, %v606_v53, 0 }
 0x336   : > { %620 = vmatpush.bf16.msrb.mxu3 %v611_v54 }
 0x33c   : > { %v652_v55 = vpop.permute.xlu1 %651 }
 0x33d   : > { %v657_v56 = vsel %vm494_vm6, %v652_v55, 0 }
 0x33e   : > { %666 = vmatpush.bf16.xpose.msra.mxu1 %v657_v56 }
 0x341   : > { %570 = vrot.lane.b32.xlu2 %v1467_v35, %s1321_s18 }
 0x344   : > { %v729_v25 = vpop.permute.xlu1 %728 }
 0x39c   : > { %v522_v57 = vpop.xlane.xlu2 %521 }
 0x39d   : > { %1232 = vrcp.f32 %v522_v57 }
 0x3a3   : > { %v1233_v58 = vpop.eup %1232 }
 0x3a4   : > { %v524_v59 = vmul.f32 %v1233_v58, %v1231_v51  ;;  %v571_v61 = vpop.permute.xlu2 %570  ;;  %v712_v51 = vsel %vm531_vm5, %v1104_v50, 0 }
 0x3a6   : > { %v525_v60 = vpack.c.bf16 %v524_v59, %v524_v59 }
 0x3a8   : > { %1096 = vmatmul.msk.bf16.vlgmr.msra.gmra.mxu2 %vm494_vm6, %v525_v60  ;;  %v1108_v60 = vld [vmem:[%s1617_s4 + $0xc] sm:$0xf] }
 0x3b8   : > { %1098 = vmatmul.msk.bf16.vlgmr.msrb.gmra.mxu2 %vm494_vm6, %v571_v61  ;;  %v791_v61 = vsel %vm531_vm5, %v1108_v60, 0 }
 0x42b   : > { %v544_v62 = vpop.f32.mrf.mxu2 }
 0x42c   : > { %v548_v63 = vpack.c.bf16 %v544_v62, %v544_v62 }
 0x42e   : > { %1097 = vmatmul.msk.bf16.vlgmr.msra.gmra.mxu3 %vm494_vm6, %v548_v63 }
 0x42f   : > { %721 = vmatpush.bf16.msra.mxu3 %v712_v51 }
 0x433   : > { %v546_v1 = vpop.f32.mrf.mxu2 }
 0x43b   : > { %v589_v2 = vpop.f32.mrf.mxu2 }
 0x43c   : > { %v593_v3 = vsel %vm494_vm6, %v589_v2, -inf }
 0x43d   : > { %594 = vmax.xlane.f32.xlu0 %v593_v3 }
 0x443   : > { %v591_v4 = vpop.f32.mrf.mxu2 }
 0x451   : > { %649 = vrot.lane.b32.xlu0 %v1467_v35, %s1322_s19 }
 0x4b0   : > { %v595_v5 = vpop.xlane.xlu0 %594 }
 0x4b1   : > { %v596_v6 = vsub.f32 %v589_v2, %v595_v5  ;;  %v565_v7 = vpop.f32.mrf.mxu3 }
 0x4b2   : > { %v569_v40 = vadd.f32 %v1221_v38, %v565_v7  ;;  %v1166_v38 = vld [vmem:[%s1623_s10 + $0x30] sm:$0xff] }
 0x4b3   : > { %v597_v9 = vmul.f32 1.442695, %v596_v6 }
 0x4b5   : > { %1234 = vpow2.f32 %v597_v9 }
 0x4b9   : > { %v567_v10 = vpop.f32.mrf.mxu3 }
 0x4bb   : > { %v1235_v11 = vpop.eup %1234 }
 0x4bc   : > { %v599_v12 = vsel %vm494_vm6, %v1235_v11, 0.0 }
 0x4bd   : > { %600 = vadd.xlane.f32.xlu2 %v599_v12 }
 0x4c3   : > { %v650_v13 = vpop.permute.xlu0 %649 }
 0x4c4   : > { %1102 = vmatmul.msk.bf16.vlgmr.msra.gmra.mxu1 %vm494_vm6, %v650_v13 }
 0x4d5   : > { %730 = vrot.lane.b32.xlu2 %v1467_v35, %s1323_s20  ;;  %s404_s20 = scalar_lea.vmem [#allocation2], %s1084_s28  ;;  %s1270_s28 = scalar_lea.hbm %s1625_s12, 16 }
 0x4d6   : > { %s1018_s0 = sshll.u32 %s404_s20, 4  ;;  %s1019_s0 = int_to_ptr.vmem [resolvable:$true] %s1018_s0 }
 0x530   : > { %v601_v16 = vpop.xlane.xlu2 %600 }
 0x531   : > { %1236 = vrcp.f32 %v601_v16 }
 0x537   : > { %v1237_v17 = vpop.eup %1236 }
 0x538   : > { %v603_v18 = vmul.f32 %v1237_v17, %v1235_v11  ;;  %v731_v19 = vpop.permute.xlu2 %730 }
 0x539   : > { %v736_v20 = vsel %vm494_vm6, %v731_v19, 0 }
 0x53a   : > { %745 = vmatpush.bf16.xpose.msrb.mxu0 %v736_v20  ;;  %v604_v21 = vpack.c.bf16 %v603_v18, %v603_v18  ;;  %v1159_v20 = vld [vmem:[%s1621_s8 + $0x8] sm:$0xff] }
 0x53c   : > { %1099 = vmatmul.msk.bf16.vlgmr.msrb.gmra.mxu3 %vm494_vm6, %v604_v21 }
 0x53d   : > { %870 = vmatpush.bf16.msrb.mxu3 %v1159_v20 }
 0x541   : > { %v668_v22 = vpop.f32.mrf.mxu1 }
 0x542   : > { %v672_v23 = vsel %vm494_vm6, %v668_v22, -inf }
 0x543   : > { %673 = vmax.xlane.f32.xlu1 %v672_v23 }
 0x549   : > { %v670_v24 = vpop.f32.mrf.mxu1 }
 0x55c   : > { %684 = vrot.lane.b32.xlu1 %v1467_v35, %s1324_s29  ;;  %s1153_s29 = sshll.u32 %s1412_s25, 3  ;;  %s1006_s25 = scalar_lea.sflag [#allocation3], %s402_s26 }
 0x55d   : > { %s1016_s19 = scalar_lea.hbm %s1625_s12, %s1153_s29 }
 0x55e   : > { %s1020_s1 = sshll.u32 %s1016_s19, 4  ;;  %s1021_s1 = int_to_ptr.hbm [resolvable:$true] %s1020_s1 }
 0x55f   : > { %s1264_s2 = sshra.s32 %s1021_s1, 4  ;;  %s1265_s2 = int_to_ptr.hbm [resolvable:$true] %s1264_s2 }
 0x560   : > { %p1271_p0 = scmp.lt.s32.totalorder %s1265_s2, %s1625_s12 }
 0x5b6   : > { %v674_v26 = vpop.xlane.xlu1 %673 }
 0x5b7   : > { %v675_v27 = vsub.f32 %v668_v22, %v674_v26 }
 0x5b9   : > { %v676_v28 = vmul.f32 1.442695, %v675_v27 }
 0x5bb   : > { %1238 = vpow2.f32 %v676_v28 }
 0x5bf   : > { %v622_v29 = vpop.f32.mrf.mxu3 }
 0x5c0   : > { %v626_v30 = vpack.c.bf16 %v622_v29, %v622_v29 }
 0x5c1   : > { %v1239_v31 = vpop.eup %1238 }
 0x5c2   : > { %1101 = vmatmul.msk.bf16.vlgmr.msra.gmra.mxu0 %vm494_vm6, %v626_v30  ;;  %v678_v32 = vsel %vm494_vm6, %v1239_v31, 0.0  ;;  %v1222_v30 = vld [vmem:[%s1619_s6] ss:$0 sm:$0xff] }
 0x5c3   : > { %679 = vadd.xlane.f32.xlu2 %v678_v32 }
 0x5c7   : > { %v624_v33 = vpop.f32.mrf.mxu3 }
 0x5ce   : > { %v685_v34 = vpop.permute.xlu1 %684 }
 0x5cf   : > { %v690_v36 = vsel %vm531_vm5, %v685_v34, 0 }
 0x5d0   : > { %699 = vmatpush.bf16.msra.mxu2 %v690_v36 }
 0x5d2   : > { %1106 = vmatmul.msk.bf16.vlgmr.msrb.gmra.mxu0 %vm494_vm6, %v729_v25 }
 0x5d4   : > { %800 = vmatpush.bf16.msrb.mxu2 %v791_v61  ;;  %v1160_v61 = vld [vmem:[%s1623_s10] sm:$0xff] }
 0x5db   : > { %763 = vrot.lane.b32.xlu2 %v1467_v35, %s1325_s15  ;;  %s1266_s15 = scalar_lea.hbm %s1265_s2, 8 }
 0x5dc   : > { %p1267_p11 = scmp.ne.s32.totalorder %s1265_s2, %s1266_s15  ;;  %p1272_p1 = scmp.lt.s32.totalorder %s1270_s28, %s1266_s15 }
 0x5de   : > { %p1268_p12 = pnand %p1267_p11, %p1429_p5  ;;  %p1273_p2 = por %p1272_p1, %p1271_p0 }
 0x5e0   : > { %p1269_p13 = pneg %p1268_p12 }
 0x5e2   : > { %p1274_p3 = pnand %p1273_p2, %p1269_p13 }
 0x636   : > { %v680_v37 = vpop.xlane.xlu2 %679 }
 0x637   : > { %1240 = vrcp.f32 %v680_v37  ;;  %v1167_v37 = vld [vmem:[%s1623_s10 + $0x38] sm:$0xff] }
 0x638   : > { %990 = vmatpush.bf16.msra.mxu0 %v1167_v37 }
 0x63c   : > { %991 = vmatpush.bf16.msra.mxu0 %v1166_v38 }
 0x63d   : > { %v1241_v39 = vpop.eup %1240 }
 0x63e   : > { %v682_v41 = vmul.f32 %v1241_v39, %v1239_v31  ;;  %v764_v42 = vpop.permute.xlu2 %763  ;;  %v1224_v39 = vld [vmem:[%s1622_s9] ss:$0 sm:$0xff] }
 0x63f   : > { %v769_v43 = vsel %vm531_vm5, %v764_v42, 0  ;;  %v644_v44 = vpop.f32.mrf.mxu0 }
 0x640   : > { %v683_v45 = vpack.c.bf16 %v682_v41, %v682_v41  ;;  %v648_v46 = vadd.f32 %v644_v44, %v569_v40  ;;  %778 = vmatpush.bf16.msrb.mxu1 %v769_v43  ;;  %v1165_v41 = vld [vmem:[%s1623_s10 + $0x28] sm:$0xff]  ;;  %v1164_v44 = vld [vmem:[%s1623_s10 + $0x20] sm:$0xff] }
 0x641   : > { %992 = vmatpush.bf16.msra.mxu0 %v1165_v41 }
 0x642   : > { %1103 = vmatmul.msk.bf16.vlgmr.msra.gmra.mxu2 %vm494_vm6, %v683_v45 }
 0x645   : > { %993 = vmatpush.bf16.msra.mxu0 %v1164_v44 }
 0x647   : > { %v646_v47 = vpop.f32.mrf.mxu0 }
 0x64f   : > { %v747_v35 = vpop.f32.mrf.mxu0 }
 0x650   : > { %v751_v48 = vsel %vm494_vm6, %v747_v35, -inf }
 0x651   : > { %752 = vmax.xlane.f32.xlu0 %v751_v48 }
 0x657   : > { %v749_v49 = vpop.f32.mrf.mxu0 }
 0x6c4   : > { %v753_v52 = vpop.xlane.xlu0 %752 }
 0x6c5   : > { %v754_v53 = vsub.f32 %v747_v35, %v753_v52  ;;  %v701_v54 = vpop.f32.mrf.mxu2  ;;  %v1163_v35 = vld [vmem:[%s1623_s10 + $0x18] sm:$0xff]  ;;  %v1162_v52 = vld [vmem:[%s1623_s10 + $0x10] sm:$0xff] }
 0x6c6   : > { %v705_v55 = vpack.c.bf16 %v701_v54, %v701_v54  ;;  %994 = vmatpush.bf16.msra.mxu0 %v1163_v35 }
 0x6c7   : > { %v755_v56 = vmul.f32 1.442695, %v754_v53 }
 0x6c8   : > { %1105 = vmatmul.msk.bf16.vlgmr.msra.gmra.mxu3 %vm494_vm6, %v705_v55 }
 0x6c9   : > { %1242 = vpow2.f32 %v755_v56 }
 0x6ca   : > { %995 = vmatpush.bf16.msra.mxu0 %v1162_v52 }
 0x6cd   : > { %v703_v57 = vpop.f32.mrf.mxu2 }
 0x6ce   : > { %v1161_v57 = vld [vmem:[%s1623_s10 + $0x8] sm:$0xff] }
 0x6cf   : > { %v1243_v58 = vpop.eup %1242  ;;  %996 = vmatpush.bf16.msra.mxu0 %v1161_v57 }
 0x6d0   : > { %v757_v59 = vsel %vm494_vm6, %v1243_v58, 0.0 }
 0x6d1   : > { %758 = vadd.xlane.f32.xlu0 %v757_v59 }
 0x6d3   : > { %997 = vmatpush.bf16.msra.mxu0 %v1160_v61 }
 0x744   : > { %v759_v62 = vpop.xlane.xlu0 %758 }
 0x745   : > { %1244 = vrcp.f32 %v759_v62 }
 0x74b   : > { %v1245_v63 = vpop.eup %1244  ;;  %v723_v1 = vpop.f32.mrf.mxu3 }
 0x74c   : > { %v761_v2 = vmul.f32 %v1245_v63, %v1243_v58  ;;  %v727_v3 = vadd.f32 %v723_v1, %v648_v46 }
 0x74e   : > { %v762_v4 = vpack.c.bf16 %v761_v2, %v761_v2 }
 0x750   : > { %1107 = vmatmul.msk.bf16.vlgmr.msrb.gmra.mxu1 %vm494_vm6, %v762_v4 }
 0x753   : > { %v725_v5 = vpop.f32.mrf.mxu3 }
 0x7cd   : > { %v780_v6 = vpop.f32.mrf.mxu1 }
 0x7ce   : > { %v784_v7 = vpack.c.bf16 %v780_v6, %v780_v6 }
 0x7d0   : > { %1109 = vmatmul.msk.bf16.vlgmr.msrb.gmra.mxu2 %vm494_vm6, %v784_v7 }
 0x7d5   : > { %v782_v9 = vpop.f32.mrf.mxu1 }
 0x853   : > { %v802_v10 = vpop.f32.mrf.mxu2 }
 0x854   : > { %v806_v11 = vadd.f32 %v802_v10, %v727_v3 }
 0x856   : > { %v1528_v12 = vadd.f32 %v806_v11, %v1444_v0  ;;  %v1158_v0 = vld [vmem:[%s1621_s8] sm:$0xff] }
 0x857   : > { %871 = vmatpush.bf16.msrb.mxu3 %v1158_v0 }
 0x858   : > { %v810_v13 = vsel %vm413_vm0, %v1528_v12, 0.0 }
 0x859   : > { %811 = vadd.xlane.f32.xlu0 %v810_v13 }
 0x85b   : > { %v804_v14 = vpop.f32.mrf.mxu2 }
 0x8cc   : > { %v812_v15 = vpop.xlane.xlu0 %811 }
 0x8cd   : > { %v813_v16 = vmul.f32 %v812_v15, %v1448_v8 }
 0x8cf   : > { %v814_v17 = vsub.f32 %v1528_v12, %v813_v16 }
 0x8d1   : > { %v815_v18 = vmul.f32 %v814_v17, %v814_v17 }
 0x8d3   : > { %v816_v19 = vsel %vm413_vm0, %v815_v18, 0.0 }
 0x8d4   : > { %817 = vadd.xlane.f32.xlu0 %v816_v19 }
 0x947   : > { %v818_v21 = vpop.xlane.xlu0 %817 }
 0x948   : > { %v819_v22 = vmul.f32 %v818_v21, %v1448_v8  ;;  %v1223_v8 = vld [vmem:[%s1620_s7] ss:$0 sm:$0xff] }
 0x94a   : > { %v820_v23 = vadd.f32 1e-05, %v819_v22 }
 0x94c   : > { %1246 = vrsqrt.f32 %v820_v23  ;;  %vm827_vm8 = vweird.f32 %v820_v23 }
 0x952   : > { %v1247_v24 = vpop.eup %1246 }
 0x953   : > { %v822_v25 = vmul.f32 %v1247_v24, %v820_v23  ;;  %vm828_vm7 = vweird.f32 %v1247_v24 }
 0x954   : > { %vm829_vm9 = vmor %vm827_vm8, %vm828_vm7 }
 0x955   : > { %v823_v26 = vmul.f32 %v1247_v24, %v822_v25 }
 0x957   : > { %v824_v27 = vmul.f32 0.5, %v823_v26  ;;  %v1225_v26 = vld [vmem:[%s1624_s11] ss:$0 sm:$0xff] }
 0x959   : > { %v825_v28 = vsub.f32 1.5, %v824_v27 }
 0x95b   : > { %v826_v29 = vmul.f32 %v1247_v24, %v825_v28 }
 0x95d   : > { %v830_v31 = vsel %vm829_vm9, %v1247_v24, %v826_v29 }
 0x95e   : > { %v831_v32 = vmul.f32 %v830_v31, %v814_v17 }
 0x960   : > { %v835_v33 = vmul.f32 %v1222_v30, %v831_v32 }
 0x962   : > { %v839_v34 = vadd.f32 %v1223_v8, %v835_v33 }
 0x964   : > { %v840_v36 = vpack.c.bf16 %v839_v34, %v839_v34 }
 0x966   : > { %1118 = vmatmul.msk.bf16.vlgmr.msrb.gmra.mxu3 %vm413_vm0, %v840_v36 }
 0x9e9   : > { %v873_v40 = vpop.f32.mrf.mxu3 }
 0x9ea   : > { %v874_v42 = vadd.f32 %v1224_v39, %v873_v40 }
 0x9ec   : > { %v878_v43 = vmul.f32 0.70710677, %v874_v42  ;;  %v877_v22 = vmul.f32 0.5, %v874_v42 }
 0x9ee   : > { %v879_v45 = vmul.f32 %v878_v43, %v878_v43 }
 0x9f0   : > { %v880_v46 = vmin.f32 %v879_v45, 16.0 }
 0x9f1   : > { %v875_v47 = vpop.f32.mrf.mxu3 }
 0x9f2   : > { %v881_v48 = vmul.f32 2.1237322e-06, %v880_v46  ;;  %v892_v49 = vmul.f32 3.8918573e-05, %v880_v46 }
 0x9f4   : > { %v882_v50 = vadd.f32 0.00028619796, %v881_v48  ;;  %v893_v51 = vadd.f32 0.001143296, %v892_v49 }
 0x9f6   : > { %v883_v53 = vmul.f32 %v882_v50, %v880_v46  ;;  %v894_v54 = vmul.f32 %v893_v51, %v880_v46 }
 0x9f8   : > { %v895_v55 = vadd.f32 0.014752088, %v894_v54  ;;  %v884_v56 = vadd.f32 0.0036580483, %v883_v53 }
 0x9fa   : > { %v896_v58 = vmul.f32 %v895_v55, %v880_v46  ;;  %v885_v60 = vmul.f32 %v884_v56, %v880_v46 }
 0x9fc   : > { %v897_v59 = vadd.f32 0.112945676, %v896_v58  ;;  %v886_v1 = vadd.f32 0.05243302, %v885_v60 }
 0x9fe   : > { %v898_v62 = vmul.f32 %v897_v59, %v880_v46  ;;  %v887_v4 = vmul.f32 %v886_v1, %v880_v46 }
 0xa00   : > { %v899_v63 = vadd.f32 0.4994258, %v898_v62  ;;  %v888_v5 = vadd.f32 0.18741608, %v887_v4 }
 0xa02   : > { %v900_v2 = vmul.f32 %v899_v63, %v880_v46  ;;  %v889_v7 = vmul.f32 %v888_v5, %v880_v46 }
 0xa04   : > { %v901_v3 = vadd.f32 1.0, %v900_v2  ;;  %v890_v13 = vadd.f32 1.1283791, %v889_v7 }
 0xa06   : > { %1248 = vrcp.f32 %v901_v3  ;;  %v913_v11 = vand.u32 2147483648, %v901_v3  ;;  %v911_v15 = vand.u32 2147483647, %v901_v3  ;;  %vm907_vm11 = vweird.f32 %v901_v3 }
 0xa07   : > { %v891_v18 = vmul.f32 %v890_v13, %v878_v43 }
 0xa08   : > { %v914_v17 = vor.u32 1.1754944e-38, %v913_v11  ;;  %vm912_vm13 = vcmp.eq.f32.partialorder %v911_v15, 8.507059e+37 }
 0xa0c   : > { %v1249_v6 = vpop.eup %1248 }
 0xa0d   : > { %v903_v9 = vmul.f32 %v1249_v6, %v901_v3  ;;  %vm908_vm10 = vweird.f32 %v1249_v6 }
 0xa0e   : > { %vm909_vm12 = vmor %vm907_vm11, %vm908_vm10 }
 0xa0f   : > { %v904_v10 = vsub.f32 1.0, %v903_v9 }
 0xa11   : > { %v905_v14 = vmul.f32 %v1249_v6, %v904_v10 }
 0xa13   : > { %v906_v16 = vadd.f32 %v1249_v6, %v905_v14 }
 0xa15   : > { %v910_v19 = vsel %vm909_vm12, %v1249_v6, %v906_v16 }
 0xa16   : > { %v915_v20 = vsel %vm912_vm13, %v914_v17, %v910_v19 }
 0xa17   : > { %v916_v0 = vmul.f32 %v915_v20, %v891_v18 }
 0xa19   : > { %v1119_v21 = vclamps-f32 %v916_v0, 1.0 }
 0xa1b   : > { %v919_v23 = vadd.f32 1.0, %v1119_v21 }
 0xa1d   : > { %v920_v24 = vmul.f32 %v919_v23, %v877_v22 }
 0xa1f   : > { %v921_v25 = vpack.c.bf16 %v920_v24, %v920_v24 }
 0xa21   : > { %998 = vmatmul.bf16.vlgmr.msra.gmra.mxu0 %v921_v25 }
 0xa9e   : > { %v999_v27 = vpop.f32.mrf.mxu0 }
 0xa9f   : > { %v1000_v28 = vadd.f32 %v1225_v26, %v999_v27 }
 0xaa1   : > { %v1003_v29 = vadd.f32 %v1000_v28, %v1528_v12 }
 0xaa3   : > { %1004 = vst.msk [vmem:[%s404_s20] sm:$0xff] %vm413_vm0, %v1003_v29 }
 0xaa4   : > { %1277 = shalt.err (!%p1274_p3)
}
 0xaa5   : > { %1168 = dma.vmem_to_hbm [thread:$0]  (%p1429_p5), %s1019_s0, 128, %s1021_s1, %s1006_s25  }
 0xaa6   : > { %v1001_v12 = vpop.f32.mrf.mxu0 }
 0xaa7 PF: > { %p1174_p4 = scmp.ge.s32.totalorder %s1312_s24, 2  ;;  %s1032_s26 = sand.u32 1, %s1300_s21  }
 0xaa8   : > { %s1033_s19 = scalar_lea.sflag [#allocation3], %s1032_s26 }
 0xaa9   : > { %p1171_p7 = pnand %p1174_p4, %p1433_p6 }
 0xaab   : > { %p1172_p8 = pneg %p1171_p7 }
 0xaad   : > { %1295 = dma.done.wait (%p1172_p8), %s1033_s19, 128  }
 0xaae   : > { %1297 = vsyncadd (%p1172_p8), %s1033_s19, 4294967168  ;;  %p22_p9 = scmp.ge.s32.totalorder %s1416_s27, 4   ;;  %s1634_s21 = smov %s1304_s22 }
 0xaaf   : > { %s1635_s22 = smov %s1308_s23  ;;  %s1636_s23 = smov %s1427_s30 }
 0xab0   : > { %s1637_s24 = smov %s1416_s27  ;;  %24 = sbr.rel (!%p22_p9) target bundleno = 7 (0x7), region = 106 }
 0xab5   :  { %1039 = vsyncpa [#allocation3], 1 }
 0xab6   :  { %1041 = vsyncpa [#allocation3 + $0x1], 1 }

// kernel: tpu_custom_call.1
= control target key start
LH: loop header
LB: loop body
LE: loop exit
PB: predicated region body
PF: predicated region fallthrough
CT: control target
= control target key end

     0   :  { %s1613_s0 = inlined_call_operand.vmem [shape: f32[16,32], index: 0, kind: input, shape index: {}]   ;;  %s1614_s1 = inlined_call_operand.vmem [shape: f32[1,32], index: 1, kind: input, shape index: {}]   ;;  %s1615_s2 = inlined_call_operand.vmem [shape: f32[1,32], index: 2, kind: input, shape index: {}]   ;;  %s1616_s3 = inlined_call_operand.vmem [shape: bf16[32,96], index: 3, kind: input, shape index: {}]   ;;  %s1617_s4 = inlined_call_operand.vmem [shape: bf16[4,8,32], index: 4, kind: input, shape index: {}]   ;;  %s1618_s5 = inlined_call_operand.vmem [shape: f32[1,32], index: 5, kind: input, shape index: {}]   ;;  %s1619_s6 = inlined_call_operand.vmem [shape: f32[1,32], index: 6, kind: input, shape index: {}]   ;;  %s1620_s7 = inlined_call_operand.vmem [shape: f32[1,32], index: 7, kind: input, shape index: {}]   ;;  %s1621_s8 = inlined_call_operand.vmem [shape: bf16[32,128], index: 8, kind: input, shape index: {}]   ;;  %s1622_s9 = inlined_call_operand.vmem [shape: f32[1,128], index: 9, kind: input, shape index: {}]   ;;  %s1623_s10 = inlined_call_operand.vmem [shape: bf16[128,32], index: 10, kind: input, shape index: {}]   ;;  %s1624_s11 = inlined_call_operand.vmem [shape: f32[1,32], index: 11, kind: input, shape index: {}]   ;;  %s1625_s12 = inlined_call_operand.hbm [shape: f32[16,32], index: 12, kind: output, shape index: {}]  }
   0x1   :  { %1626 = sst [smem:[#allocation5_spill]] %s1613_s0 }
   0x2   :  { %1627 = sst [smem:[#allocation6_spill]] %s1614_s1 }
   0x3   :  { %1628 = sst [smem:[#allocation7_spill]] %s1615_s2 }
   0x4   :  { %17 = vsyncpa [#allocation3], 0 }
   0x5   :  { %19 = vsyncpa [#allocation3 + $0x1], 0  ;;  %s1391_s21 = smov 0   ;;  %s1393_s22 = smov 0  }
   0x6   :  { %s1395_s23 = smov 0   ;;  %s1397_s24 = smov 0  }
   0x7 LB: > { %s1412_s25 = sadd.s32 4294967295, %s1312_s24   ;;  %s1080_s26 = sadd.s32 4294967294, %s1312_s24   ;;  %s1312_s24 = sphi %s1397_s24, %s1637_s24   ;;  %s1308_s23 = sphi %s1395_s23, %s1636_s23   ;;  %s1304_s22 = sphi %s1393_s22, %s1635_s22   ;;  %s1300_s21 = sphi %s1391_s21, %s1634_s21  }
   0x8   : > { %s1416_s27 = sadd.s32 1, %s1312_s24   ;;  %s289_s28 = sadd.s32 1, %s1308_s23 }
   0x9   : > { %s286_s29 = ssub.s32 %s1312_s24, %s1416_s27  ;;  %p299_p0 = scmp.ne.s32.totalorder %s1308_s23, %s1304_s22 }
   0xa   : > { %p287_p1 = scmp.eq.s32.totalorder %s286_s29, 0  ;;  %p300_p2 = scmp.eq.s32.totalorder %s1412_s25, 1 }
   0xb   : > { %p305_p3 = scmp.ne.s32.totalorder %s1304_s22, %s1300_s21  ;;  %p306_p4 = scmp.eq.s32.totalorder %s1080_s26, 1 }
   0xc   : > { %s1427_s30 = scalar_select %p287_p1, %s1308_s23, %s289_s28  }
   0xd   : > { %p1429_p5 = por %p300_p2, %p299_p0  ;;  %p1433_p6 = por %p306_p4, %p305_p3 }
   0xe   : > { %p1083_p7 = scmp.ge.s32.totalorder %s1312_s24, 1  ;;  %p364_p8 = scmp.lt.s32.totalorder %s1312_s24, 3 }
  0x10   : > { %p365_p9 = pnand %p1083_p7, %p364_p8 }
  0x11   : > { %p405_p10 = scmp.lt.s32.totalorder (!%p365_p9), %s1412_s25, 1  ;;  %s1631_s0 = sld [smem:[#allocation5_spill]] (!%p365_p9) }
  0x12   : > { %368 = sbr.rel (%p365_p9) target bundleno = 2727 (0xaa7), region = 68  ;;  %s1632_s1 = sld [smem:[#allocation6_spill]] (!%p365_p9) }
  0x13   : > { %s1633_s2 = sld [smem:[#allocation7_spill]] (!%p365_p9)  ;;  %s1316_s20 = smov (!%p365_p9), 64  }
  0x14   : > { %s1317_s26 = smov (!%p365_p9), 96   ;;  %s1318_s28 = smov (!%p365_p9), 56  }
  0x15   : > { %s1319_s29 = smov (!%p365_p9), 80   ;;  %s1321_s18 = smov (!%p365_p9), 120  }
  0x17   : > { %s406_s15 = scalar_select %p405_p10, %s1412_s25, 1  ;;  %vm413_vm0 = vcmask 261120   ;;  %v1314_v2 = vmov 32.0   ;;  %v1157_v14 = vld [vmem:[%s1616_s3 + $0x8] sm:$0xff]  ;;  %v1156_v15 = vld [vmem:[%s1616_s3] sm:$0xff]  ;;  %vm531_vm5 = vcmask 1043456  }
  0x18   : > { %1226 = vrcp.f32 %v1314_v2  ;;  %477 = vmatpush.bf16.msra.mxu1 %v1157_v14  ;;  %v1219_v25 = vld [vmem:[%s1632_s1] ss:$0 sm:$0xff]  ;;  %vm494_vm6 = vcmask 64512   ;;  %v1100_v14 = vld [vmem:[%s1617_s4 + $0x4] sm:$0xf] }
  0x19   : > { %s1085_s16 = sshll.u32 %s406_s15, 3  ;;  %v1220_v28 = vld [vmem:[%s1633_s2] ss:$0 sm:$0xff]  ;;  %s1320_s15 = smov 104  }
  0x1a   : > { %s408_s19 = scalar_lea.vmem %s1631_s0, %s1085_s16  ;;  %v549_v46 = vld [vmem:[%s1617_s4] sm:$0xf] }
  0x1b   : > { %v1444_v0 = vld [vmem:[%s408_s19] sm:$0xff]  ;;  %s1315_s19 = smov 88   ;;  %v554_v47 = vsel %vm531_vm5, %v549_v46, 0 }
  0x1c   : > { %v414_v1 = vsel %vm413_vm0, %v1444_v0, 0.0  ;;  %478 = vmatpush.bf16.msra.mxu1 %v1156_v15  ;;  %563 = vmatpush.bf16.msra.mxu3 %v554_v47  ;;  %v633_v15 = vsel %vm531_vm5, %v1100_v14, 0 }
  0x1d   : > { %415 = vadd.xlane.f32.xlu0 %v414_v1  ;;  %642 = vmatpush.bf16.msra.mxu0 %v633_v15 }
  0x1e   : > { %v1227_v3 = vpop.eup %1226 }
  0x1f   : > { %v418_v4 = vmul.f32 32.0, %v1227_v3  ;;  %vm422_vm1 = vweird.f32 %v1227_v3 }
  0x21   : > { %v419_v5 = vsub.f32 1.0, %v418_v4 }
  0x23   : > { %v420_v6 = vmul.f32 %v1227_v3, %v419_v5 }
  0x25   : > { %v421_v7 = vadd.f32 %v1227_v3, %v420_v6 }
  0x27   : > { %v1448_v8 = vsel %vm422_vm1, %v1227_v3, %v421_v7 }
  0x90   : > { %v416_v9 = vpop.xlane.xlu0 %415 }
  0x91   : > { %v424_v10 = vmul.f32 %v1448_v8, %v416_v9 }
  0x93   : > { %v425_v11 = vsub.f32 %v1444_v0, %v424_v10 }
  0x95   : > { %v426_v12 = vmul.f32 %v425_v11, %v425_v11 }
  0x97   : > { %v427_v13 = vsel %vm413_vm0, %v426_v12, 0.0 }
  0x98   : > { %428 = vadd.xlane.f32.xlu0 %v427_v13 }
 0x10b   : > { %v429_v16 = vpop.xlane.xlu0 %428 }
 0x10c   : > { %v430_v17 = vmul.f32 %v429_v16, %v1448_v8 }
 0x10e   : > { %v431_v18 = vadd.f32 1e-05, %v430_v17 }
 0x110   : > { %1228 = vrsqrt.f32 %v431_v18  ;;  %vm438_vm3 = vweird.f32 %v431_v18 }
 0x116   : > { %v1229_v19 = vpop.eup %1228 }
 0x117   : > { %v433_v20 = vmul.f32 %v1229_v19, %v431_v18  ;;  %vm439_vm2 = vweird.f32 %v1229_v19 }
 0x118   : > { %vm440_vm4 = vmor %vm438_vm3, %vm439_vm2 }
 0x119   : > { %v434_v21 = vmul.f32 %v1229_v19, %v433_v20 }
 0x11b   : > { %v435_v22 = vmul.f32 0.5, %v434_v21 }
 0x11d   : > { %v436_v23 = vsub.f32 1.5, %v435_v22 }
 0x11f   : > { %v437_v24 = vmul.f32 %v1229_v19, %v436_v23 }
 0x121   : > { %v441_v26 = vsel %vm440_vm4, %v1229_v19, %v437_v24 }
 0x122   : > { %v442_v27 = vmul.f32 %v441_v26, %v425_v11 }
 0x124   : > { %v446_v29 = vmul.f32 %v1219_v25, %v442_v27 }
 0x126   : > { %v450_v30 = vadd.f32 %v1220_v28, %v446_v29 }
 0x128   : > { %v451_v31 = vpack.c.bf16 %v450_v30, %v450_v30 }
 0x12a   : > { %1094 = vmatmul.msk.bf16.vlgmr.msra.gmra.mxu1 %vm413_vm0, %v451_v31 }
 0x1a7   : > { %v480_v32 = vpop.f32.mrf.mxu1 }
 0x1a8   : > { %v488_v33 = vpack.c.bf16 %v480_v32, %v480_v32 }
 0x1aa   : > { %v490_v34 = vunpack.c.l.b16 %v488_v33 }
 0x1ac   : > { %v1467_v35 = vpack.c.b16 %v490_v34, %v490_v34 }
 0x1ae   : > { %572 = vrot.lane.b32.xlu0 %v1467_v35, %s1315_s19  ;;  %526 = vrot.lane.b32.xlu2 %v1467_v35, %s1316_s20  ;;  %s1322_s19 = smov 112   ;;  %s1323_s20 = smov 72  }
 0x1af   : > { %492 = vrot.lane.b32.xlu1 %v1467_v35, %s1317_s26  ;;  %v482_v36 = vpop.f32.mrf.mxu1  ;;  %s402_s26 = sand.u32 1, %s1304_s22  }
 0x208   : > { %v527_v37 = vpop.permute.xlu2 %526 }
 0x209   : > { %v533_v38 = vsel %vm531_vm5, %v527_v37, 0 }
 0x20a   : > { %542 = vmatpush.bf16.msra.mxu2 %v533_v38  ;;  %v1221_v38 = vld [vmem:[%s1618_s5] ss:$0 sm:$0xff] }
 0x220   : > { %v573_v39 = vpop.permute.xlu0 %572 }
 0x221   : > { %v493_v40 = vpop.permute.xlu1 %492  ;;  %v578_v41 = vsel %vm494_vm6, %v573_v39, 0 }
 0x222   : > { %v499_v42 = vsel %vm494_vm6, %v493_v40, 0  ;;  %587 = vmatpush.bf16.xpose.msrb.mxu2 %v578_v41 }
 0x223   : > { %508 = vmatpush.bf16.xpose.msrb.mxu1 %v499_v42 }
 0x22a   : > { %1095 = vmatmul.msk.bf16.vlgmr.msrb.gmra.mxu1 %vm494_vm6, %v488_v33 }
 0x2a7   : > { %v510_v43 = vpop.f32.mrf.mxu1 }
 0x2a8   : > { %v514_v44 = vsel %vm494_vm6, %v510_v43, -inf }
 0x2a9   : > { %515 = vmax.xlane.f32.xlu1 %v514_v44 }
 0x2af   : > { %v512_v45 = vpop.f32.mrf.mxu1 }
 0x2c2   : > { %605 = vrot.lane.b32.xlu1 %v1467_v35, %s1318_s28  ;;  %s1084_s28 = sshll.u32 %s402_s26, 3 }
 0x2ca   : > { %651 = vrot.lane.b32.xlu1 %v1467_v35, %s1319_s29  ;;  %s1324_s29 = smov 48  }
 0x2d2   : > { %728 = vrot.lane.b32.xlu1 %v1467_v35, %s1320_s15  ;;  %s1325_s15 = smov 40  }
 0x31c   : > { %v516_v48 = vpop.xlane.xlu1 %515 }
 0x31d   : > { %v517_v49 = vsub.f32 %v510_v43, %v516_v48 }
 0x31f   : > { %v518_v50 = vmul.f32 1.442695, %v517_v49 }
 0x321   : > { %1230 = vpow2.f32 %v518_v50  ;;  %v1104_v50 = vld [vmem:[%s1617_s4 + $0x8] sm:$0xf] }
 0x327   : > { %v1231_v51 = vpop.eup %1230 }
 0x328   : > { %v520_v52 = vsel %vm494_vm6, %v1231_v51, 0.0 }
 0x329   : > { %521 = vadd.xlane.f32.xlu2 %v520_v52 }
 0x334   : > { %v606_v53 = vpop.permute.xlu1 %605 }
 0x335   : > { %v611_v54 = vsel %vm531_vm5, %v606_v53, 0 }
 0x336   : > { %620 = vmatpush.bf16.msrb.mxu3 %v611_v54 }
 0x33c   : > { %v652_v55 = vpop.permute.xlu1 %651 }
 0x33d   : > { %v657_v56 = vsel %vm494_vm6, %v652_v55, 0 }
 0x33e   : > { %666 = vmatpush.bf16.xpose.msra.mxu1 %v657_v56 }
 0x341   : > { %570 = vrot.lane.b32.xlu2 %v1467_v35, %s1321_s18 }
 0x344   : > { %v729_v25 = vpop.permute.xlu1 %728 }
 0x39c   : > { %v522_v57 = vpop.xlane.xlu2 %521 }
 0x39d   : > { %1232 = vrcp.f32 %v522_v57 }
 0x3a3   : > { %v1233_v58 = vpop.eup %1232 }
 0x3a4   : > { %v524_v59 = vmul.f32 %v1233_v58, %v1231_v51  ;;  %v571_v61 = vpop.permute.xlu2 %570  ;;  %v712_v51 = vsel %vm531_vm5, %v1104_v50, 0 }
 0x3a6   : > { %v525_v60 = vpack.c.bf16 %v524_v59, %v524_v59 }
 0x3a8   : > { %1096 = vmatmul.msk.bf16.vlgmr.msra.gmra.mxu2 %vm494_vm6, %v525_v60  ;;  %v1108_v60 = vld [vmem:[%s1617_s4 + $0xc] sm:$0xf] }
 0x3b8   : > { %1098 = vmatmul.msk.bf16.vlgmr.msrb.gmra.mxu2 %vm494_vm6, %v571_v61  ;;  %v791_v61 = vsel %vm531_vm5, %v1108_v60, 0 }
 0x42b   : > { %v544_v62 = vpop.f32.mrf.mxu2 }
 0x42c   : > { %v548_v63 = vpack.c.bf16 %v544_v62, %v544_v62 }
 0x42e   : > { %1097 = vmatmul.msk.bf16.vlgmr.msra.gmra.mxu3 %vm494_vm6, %v548_v63 }
 0x42f   : > { %721 = vmatpush.bf16.msra.mxu3 %v712_v51 }
 0x433   : > { %v546_v1 = vpop.f32.mrf.mxu2 }
 0x43b   : > { %v589_v2 = vpop.f32.mrf.mxu2 }
 0x43c   : > { %v593_v3 = vsel %vm494_vm6, %v589_v2, -inf }
 0x43d   : > { %594 = vmax.xlane.f32.xlu0 %v593_v3 }
 0x443   : > { %v591_v4 = vpop.f32.mrf.mxu2 }
 0x451   : > { %649 = vrot.lane.b32.xlu0 %v1467_v35, %s1322_s19 }
 0x4b0   : > { %v595_v5 = vpop.xlane.xlu0 %594 }
 0x4b1   : > { %v596_v6 = vsub.f32 %v589_v2, %v595_v5  ;;  %v565_v7 = vpop.f32.mrf.mxu3 }
 0x4b2   : > { %v569_v40 = vadd.f32 %v1221_v38, %v565_v7  ;;  %v1166_v38 = vld [vmem:[%s1623_s10 + $0x30] sm:$0xff] }
 0x4b3   : > { %v597_v9 = vmul.f32 1.442695, %v596_v6 }
 0x4b5   : > { %1234 = vpow2.f32 %v597_v9 }
 0x4b9   : > { %v567_v10 = vpop.f32.mrf.mxu3 }
 0x4bb   : > { %v1235_v11 = vpop.eup %1234 }
 0x4bc   : > { %v599_v12 = vsel %vm494_vm6, %v1235_v11, 0.0 }
 0x4bd   : > { %600 = vadd.xlane.f32.xlu2 %v599_v12 }
 0x4c3   : > { %v650_v13 = vpop.permute.xlu0 %649 }
 0x4c4   : > { %1102 = vmatmul.msk.bf16.vlgmr.msra.gmra.mxu1 %vm494_vm6, %v650_v13 }
 0x4d5   : > { %730 = vrot.lane.b32.xlu2 %v1467_v35, %s1323_s20  ;;  %s404_s20 = scalar_lea.vmem [#allocation2], %s1084_s28  ;;  %s1270_s28 = scalar_lea.hbm %s1625_s12, 16 }
 0x4d6   : > { %s1018_s0 = sshll.u32 %s404_s20, 4  ;;  %s1019_s0 = int_to_ptr.vmem [resolvable:$true] %s1018_s0 }
 0x530   : > { %v601_v16 = vpop.xlane.xlu2 %600 }
 0x531   : > { %1236 = vrcp.f32 %v601_v16 }
 0x537   : > { %v1237_v17 = vpop.eup %1236 }
 0x538   : > { %v603_v18 = vmul.f32 %v1237_v17, %v1235_v11  ;;  %v731_v19 = vpop.permute.xlu2 %730 }
 0x539   : > { %v736_v20 = vsel %vm494_vm6, %v731_v19, 0 }
 0x53a   : > { %745 = vmatpush.bf16.xpose.msrb.mxu0 %v736_v20  ;;  %v604_v21 = vpack.c.bf16 %v603_v18, %v603_v18  ;;  %v1159_v20 = vld [vmem:[%s1621_s8 + $0x8] sm:$0xff] }
 0x53c   : > { %1099 = vmatmul.msk.bf16.vlgmr.msrb.gmra.mxu3 %vm494_vm6, %v604_v21 }
 0x53d   : > { %870 = vmatpush.bf16.msrb.mxu3 %v1159_v20 }
 0x541   : > { %v668_v22 = vpop.f32.mrf.mxu1 }
 0x542   : > { %v672_v23 = vsel %vm494_vm6, %v668_v22, -inf }
 0x543   : > { %673 = vmax.xlane.f32.xlu1 %v672_v23 }
 0x549   : > { %v670_v24 = vpop.f32.mrf.mxu1 }
 0x55c   : > { %684 = vrot.lane.b32.xlu1 %v1467_v35, %s1324_s29  ;;  %s1153_s29 = sshll.u32 %s1412_s25, 3  ;;  %s1006_s25 = scalar_lea.sflag [#allocation3], %s402_s26 }
 0x55d   : > { %s1016_s19 = scalar_lea.hbm %s1625_s12, %s1153_s29 }
 0x55e   : > { %s1020_s1 = sshll.u32 %s1016_s19, 4  ;;  %s1021_s1 = int_to_ptr.hbm [resolvable:$true] %s1020_s1 }
 0x55f   : > { %s1264_s2 = sshra.s32 %s1021_s1, 4  ;;  %s1265_s2 = int_to_ptr.hbm [resolvable:$true] %s1264_s2 }
 0x560   : > { %p1271_p0 = scmp.lt.s32.totalorder %s1265_s2, %s1625_s12 }
 0x5b6   : > { %v674_v26 = vpop.xlane.xlu1 %673 }
 0x5b7   : > { %v675_v27 = vsub.f32 %v668_v22, %v674_v26 }
 0x5b9   : > { %v676_v28 = vmul.f32 1.442695, %v675_v27 }
 0x5bb   : > { %1238 = vpow2.f32 %v676_v28 }
 0x5bf   : > { %v622_v29 = vpop.f32.mrf.mxu3 }
 0x5c0   : > { %v626_v30 = vpack.c.bf16 %v622_v29, %v622_v29 }
 0x5c1   : > { %v1239_v31 = vpop.eup %1238 }
 0x5c2   : > { %1101 = vmatmul.msk.bf16.vlgmr.msra.gmra.mxu0 %vm494_vm6, %v626_v30  ;;  %v678_v32 = vsel %vm494_vm6, %v1239_v31, 0.0  ;;  %v1222_v30 = vld [vmem:[%s1619_s6] ss:$0 sm:$0xff] }
 0x5c3   : > { %679 = vadd.xlane.f32.xlu2 %v678_v32 }
 0x5c7   : > { %v624_v33 = vpop.f32.mrf.mxu3 }
 0x5ce   : > { %v685_v34 = vpop.permute.xlu1 %684 }
 0x5cf   : > { %v690_v36 = vsel %vm531_vm5, %v685_v34, 0 }
 0x5d0   : > { %699 = vmatpush.bf16.msra.mxu2 %v690_v36 }
 0x5d2   : > { %1106 = vmatmul.msk.bf16.vlgmr.msrb.gmra.mxu0 %vm494_vm6, %v729_v25 }
 0x5d4   : > { %800 = vmatpush.bf16.msrb.mxu2 %v791_v61  ;;  %v1160_v61 = vld [vmem:[%s1623_s10] sm:$0xff] }
 0x5db   : > { %763 = vrot.lane.b32.xlu2 %v1467_v35, %s1325_s15  ;;  %s1266_s15 = scalar_lea.hbm %s1265_s2, 8 }
 0x5dc   : > { %p1267_p11 = scmp.ne.s32.totalorder %s1265_s2, %s1266_s15  ;;  %p1272_p1 = scmp.lt.s32.totalorder %s1270_s28, %s1266_s15 }
 0x5de   : > { %p1268_p12 = pnand %p1267_p11, %p1429_p5  ;;  %p1273_p2 = por %p1272_p1, %p1271_p0 }
 0x5e0   : > { %p1269_p13 = pneg %p1268_p12 }
 0x5e2   : > { %p1274_p3 = pnand %p1273_p2, %p1269_p13 }
 0x636   : > { %v680_v37 = vpop.xlane.xlu2 %679 }
 0x637   : > { %1240 = vrcp.f32 %v680_v37  ;;  %v1167_v37 = vld [vmem:[%s1623_s10 + $0x38] sm:$0xff] }
 0x638   : > { %990 = vmatpush.bf16.msra.mxu0 %v1167_v37 }
 0x63c   : > { %991 = vmatpush.bf16.msra.mxu0 %v1166_v38 }
 0x63d   : > { %v1241_v39 = vpop.eup %1240 }
 0x63e   : > { %v682_v41 = vmul.f32 %v1241_v39, %v1239_v31  ;;  %v764_v42 = vpop.permute.xlu2 %763  ;;  %v1224_v39 = vld [vmem:[%s1622_s9] ss:$0 sm:$0xff] }
 0x63f   : > { %v769_v43 = vsel %vm531_vm5, %v764_v42, 0  ;;  %v644_v44 = vpop.f32.mrf.mxu0 }
 0x640   : > { %v683_v45 = vpack.c.bf16 %v682_v41, %v682_v41  ;;  %v648_v46 = vadd.f32 %v644_v44, %v569_v40  ;;  %778 = vmatpush.bf16.msrb.mxu1 %v769_v43  ;;  %v1165_v41 = vld [vmem:[%s1623_s10 + $0x28] sm:$0xff]  ;;  %v1164_v44 = vld [vmem:[%s1623_s10 + $0x20] sm:$0xff] }
 0x641   : > { %992 = vmatpush.bf16.msra.mxu0 %v1165_v41 }
 0x642   : > { %1103 = vmatmul.msk.bf16.vlgmr.msra.gmra.mxu2 %vm494_vm6, %v683_v45 }
 0x645   : > { %993 = vmatpush.bf16.msra.mxu0 %v1164_v44 }
 0x647   : > { %v646_v47 = vpop.f32.mrf.mxu0 }
 0x64f   : > { %v747_v35 = vpop.f32.mrf.mxu0 }
 0x650   : > { %v751_v48 = vsel %vm494_vm6, %v747_v35, -inf }
 0x651   : > { %752 = vmax.xlane.f32.xlu0 %v751_v48 }
 0x657   : > { %v749_v49 = vpop.f32.mrf.mxu0 }
 0x6c4   : > { %v753_v52 = vpop.xlane.xlu0 %752 }
 0x6c5   : > { %v754_v53 = vsub.f32 %v747_v35, %v753_v52  ;;  %v701_v54 = vpop.f32.mrf.mxu2  ;;  %v1163_v35 = vld [vmem:[%s1623_s10 + $0x18] sm:$0xff]  ;;  %v1162_v52 = vld [vmem:[%s1623_s10 + $0x10] sm:$0xff] }
 0x6c6   : > { %v705_v55 = vpack.c.bf16 %v701_v54, %v701_v54  ;;  %994 = vmatpush.bf16.msra.mxu0 %v1163_v35 }
 0x6c7   : > { %v755_v56 = vmul.f32 1.442695, %v754_v53 }
 0x6c8   : > { %1105 = vmatmul.msk.bf16.vlgmr.msra.gmra.mxu3 %vm494_vm6, %v705_v55 }
 0x6c9   : > { %1242 = vpow2.f32 %v755_v56 }
 0x6ca   : > { %995 = vmatpush.bf16.msra.mxu0 %v1162_v52 }
 0x6cd   : > { %v703_v57 = vpop.f32.mrf.mxu2 }
 0x6ce   : > { %v1161_v57 = vld [vmem:[%s1623_s10 + $0x8] sm:$0xff] }
 0x6cf   : > { %v1243_v58 = vpop.eup %1242  ;;  %996 = vmatpush.bf16.msra.mxu0 %v1161_v57 }
 0x6d0   : > { %v757_v59 = vsel %vm494_vm6, %v1243_v58, 0.0 }
 0x6d1   : > { %758 = vadd.xlane.f32.xlu0 %v757_v59 }
 0x6d3   : > { %997 = vmatpush.bf16.msra.mxu0 %v1160_v61 }
 0x744   : > { %v759_v62 = vpop.xlane.xlu0 %758 }
 0x745   : > { %1244 = vrcp.f32 %v759_v62 }
 0x74b   : > { %v1245_v63 = vpop.eup %1244  ;;  %v723_v1 = vpop.f32.mrf.mxu3 }
 0x74c   : > { %v761_v2 = vmul.f32 %v1245_v63, %v1243_v58  ;;  %v727_v3 = vadd.f32 %v723_v1, %v648_v46 }
 0x74e   : > { %v762_v4 = vpack.c.bf16 %v761_v2, %v761_v2 }
 0x750   : > { %1107 = vmatmul.msk.bf16.vlgmr.msrb.gmra.mxu1 %vm494_vm6, %v762_v4 }
 0x753   : > { %v725_v5 = vpop.f32.mrf.mxu3 }
 0x7cd   : > { %v780_v6 = vpop.f32.mrf.mxu1 }
 0x7ce   : > { %v784_v7 = vpack.c.bf16 %v780_v6, %v780_v6 }
 0x7d0   : > { %1109 = vmatmul.msk.bf16.vlgmr.msrb.gmra.mxu2 %vm494_vm6, %v784_v7 }
 0x7d5   : > { %v782_v9 = vpop.f32.mrf.mxu1 }
 0x853   : > { %v802_v10 = vpop.f32.mrf.mxu2 }
 0x854   : > { %v806_v11 = vadd.f32 %v802_v10, %v727_v3 }
 0x856   : > { %v1528_v12 = vadd.f32 %v806_v11, %v1444_v0  ;;  %v1158_v0 = vld [vmem:[%s1621_s8] sm:$0xff] }
 0x857   : > { %871 = vmatpush.bf16.msrb.mxu3 %v1158_v0 }
 0x858   : > { %v810_v13 = vsel %vm413_vm0, %v1528_v12, 0.0 }
 0x859   : > { %811 = vadd.xlane.f32.xlu0 %v810_v13 }
 0x85b   : > { %v804_v14 = vpop.f32.mrf.mxu2 }
 0x8cc   : > { %v812_v15 = vpop.xlane.xlu0 %811 }
 0x8cd   : > { %v813_v16 = vmul.f32 %v812_v15, %v1448_v8 }
 0x8cf   : > { %v814_v17 = vsub.f32 %v1528_v12, %v813_v16 }
 0x8d1   : > { %v815_v18 = vmul.f32 %v814_v17, %v814_v17 }
 0x8d3   : > { %v816_v19 = vsel %vm413_vm0, %v815_v18, 0.0 }
 0x8d4   : > { %817 = vadd.xlane.f32.xlu0 %v816_v19 }
 0x947   : > { %v818_v21 = vpop.xlane.xlu0 %817 }
 0x948   : > { %v819_v22 = vmul.f32 %v818_v21, %v1448_v8  ;;  %v1223_v8 = vld [vmem:[%s1620_s7] ss:$0 sm:$0xff] }
 0x94a   : > { %v820_v23 = vadd.f32 1e-05, %v819_v22 }
 0x94c   : > { %1246 = vrsqrt.f32 %v820_v23  ;;  %vm827_vm8 = vweird.f32 %v820_v23 }
 0x952   : > { %v1247_v24 = vpop.eup %1246 }
 0x953   : > { %v822_v25 = vmul.f32 %v1247_v24, %v820_v23  ;;  %vm828_vm7 = vweird.f32 %v1247_v24 }
 0x954   : > { %vm829_vm9 = vmor %vm827_vm8, %vm828_vm7 }
 0x955   : > { %v823_v26 = vmul.f32 %v1247_v24, %v822_v25 }
 0x957   : > { %v824_v27 = vmul.f32 0.5, %v823_v26  ;;  %v1225_v26 = vld [vmem:[%s1624_s11] ss:$0 sm:$0xff] }
 0x959   : > { %v825_v28 = vsub.f32 1.5, %v824_v27 }
 0x95b   : > { %v826_v29 = vmul.f32 %v1247_v24, %v825_v28 }
 0x95d   : > { %v830_v31 = vsel %vm829_vm9, %v1247_v24, %v826_v29 }
 0x95e   : > { %v831_v32 = vmul.f32 %v830_v31, %v814_v17 }
 0x960   : > { %v835_v33 = vmul.f32 %v1222_v30, %v831_v32 }
 0x962   : > { %v839_v34 = vadd.f32 %v1223_v8, %v835_v33 }
 0x964   : > { %v840_v36 = vpack.c.bf16 %v839_v34, %v839_v34 }
 0x966   : > { %1118 = vmatmul.msk.bf16.vlgmr.msrb.gmra.mxu3 %vm413_vm0, %v840_v36 }
 0x9e9   : > { %v873_v40 = vpop.f32.mrf.mxu3 }
 0x9ea   : > { %v874_v42 = vadd.f32 %v1224_v39, %v873_v40 }
 0x9ec   : > { %v878_v43 = vmul.f32 0.70710677, %v874_v42  ;;  %v877_v22 = vmul.f32 0.5, %v874_v42 }
 0x9ee   : > { %v879_v45 = vmul.f32 %v878_v43, %v878_v43 }
 0x9f0   : > { %v880_v46 = vmin.f32 %v879_v45, 16.0 }
 0x9f1   : > { %v875_v47 = vpop.f32.mrf.mxu3 }
 0x9f2   : > { %v881_v48 = vmul.f32 2.1237322e-06, %v880_v46  ;;  %v892_v49 = vmul.f32 3.8918573e-05, %v880_v46 }
 0x9f4   : > { %v882_v50 = vadd.f32 0.00028619796, %v881_v48  ;;  %v893_v51 = vadd.f32 0.001143296, %v892_v49 }
 0x9f6   : > { %v883_v53 = vmul.f32 %v882_v50, %v880_v46  ;;  %v894_v54 = vmul.f32 %v893_v51, %v880_v46 }
 0x9f8   : > { %v895_v55 = vadd.f32 0.014752088, %v894_v54  ;;  %v884_v56 = vadd.f32 0.0036580483, %v883_v53 }
 0x9fa   : > { %v896_v58 = vmul.f32 %v895_v55, %v880_v46  ;;  %v885_v60 = vmul.f32 %v884_v56, %v880_v46 }
 0x9fc   : > { %v897_v59 = vadd.f32 0.112945676, %v896_v58  ;;  %v886_v1 = vadd.f32 0.05243302, %v885_v60 }
 0x9fe   : > { %v898_v62 = vmul.f32 %v897_v59, %v880_v46  ;;  %v887_v4 = vmul.f32 %v886_v1, %v880_v46 }
 0xa00   : > { %v899_v63 = vadd.f32 0.4994258, %v898_v62  ;;  %v888_v5 = vadd.f32 0.18741608, %v887_v4 }
 0xa02   : > { %v900_v2 = vmul.f32 %v899_v63, %v880_v46  ;;  %v889_v7 = vmul.f32 %v888_v5, %v880_v46 }
 0xa04   : > { %v901_v3 = vadd.f32 1.0, %v900_v2  ;;  %v890_v13 = vadd.f32 1.1283791, %v889_v7 }
 0xa06   : > { %1248 = vrcp.f32 %v901_v3  ;;  %v913_v11 = vand.u32 2147483648, %v901_v3  ;;  %v911_v15 = vand.u32 2147483647, %v901_v3  ;;  %vm907_vm11 = vweird.f32 %v901_v3 }
 0xa07   : > { %v891_v18 = vmul.f32 %v890_v13, %v878_v43 }
 0xa08   : > { %v914_v17 = vor.u32 1.1754944e-38, %v913_v11  ;;  %vm912_vm13 = vcmp.eq.f32.partialorder %v911_v15, 8.507059e+37 }
 0xa0c   : > { %v1249_v6 = vpop.eup %1248 }
 0xa0d   : > { %v903_v9 = vmul.f32 %v1249_v6, %v901_v3  ;;  %vm908_vm10 = vweird.f32 %v1249_v6 }
 0xa0e   : > { %vm909_vm12 = vmor %vm907_vm11, %vm908_vm10 }
 0xa0f   : > { %v904_v10 = vsub.f32 1.0, %v903_v9 }
 0xa11   : > { %v905_v14 = vmul.f32 %v1249_v6, %v904_v10 }
 0xa13   : > { %v906_v16 = vadd.f32 %v1249_v6, %v905_v14 }
 0xa15   : > { %v910_v19 = vsel %vm909_vm12, %v1249_v6, %v906_v16 }
 0xa16   : > { %v915_v20 = vsel %vm912_vm13, %v914_v17, %v910_v19 }
 0xa17   : > { %v916_v0 = vmul.f32 %v915_v20, %v891_v18 }
 0xa19   : > { %v1119_v21 = vclamps-f32 %v916_v0, 1.0 }
 0xa1b   : > { %v919_v23 = vadd.f32 1.0, %v1119_v21 }
 0xa1d   : > { %v920_v24 = vmul.f32 %v919_v23, %v877_v22 }
 0xa1f   : > { %v921_v25 = vpack.c.bf16 %v920_v24, %v920_v24 }
 0xa21   : > { %998 = vmatmul.bf16.vlgmr.msra.gmra.mxu0 %v921_v25 }
 0xa9e   : > { %v999_v27 = vpop.f32.mrf.mxu0 }
 0xa9f   : > { %v1000_v28 = vadd.f32 %v1225_v26, %v999_v27 }
 0xaa1   : > { %v1003_v29 = vadd.f32 %v1000_v28, %v1528_v12 }
 0xaa3   : > { %1004 = vst.msk [vmem:[%s404_s20] sm:$0xff] %vm413_vm0, %v1003_v29 }
 0xaa4   : > { %1277 = shalt.err (!%p1274_p3)
}
 0xaa5   : > { %1168 = dma.vmem_to_hbm [thread:$0]  (%p1429_p5), %s1019_s0, 128, %s1021_s1, %s1006_s25  }
 0xaa6   : > { %v1001_v12 = vpop.f32.mrf.mxu0 }
 0xaa7 PF: > { %p1174_p4 = scmp.ge.s32.totalorder %s1312_s24, 2  ;;  %s1032_s26 = sand.u32 1, %s1300_s21  }
 0xaa8   : > { %s1033_s19 = scalar_lea.sflag [#allocation3], %s1032_s26 }
 0xaa9   : > { %p1171_p7 = pnand %p1174_p4, %p1433_p6 }
 0xaab   : > { %p1172_p8 = pneg %p1171_p7 }
 0xaad   : > { %1295 = dma.done.wait (%p1172_p8), %s1033_s19, 128  }
 0xaae   : > { %1297 = vsyncadd (%p1172_p8), %s1033_s19, 4294967168  ;;  %p22_p9 = scmp.ge.s32.totalorder %s1416_s27, 4   ;;  %s1634_s21 = smov %s1304_s22 }
 0xaaf   : > { %s1635_s22 = smov %s1308_s23  ;;  %s1636_s23 = smov %s1427_s30 }
 0xab0   : > { %s1637_s24 = smov %s1416_s27  ;;  %24 = sbr.rel (!%p22_p9) target bundleno = 7 (0x7), region = 106 }
 0xab5   :  { %1039 = vsyncpa [#allocation3], 1 }
 0xab6   :  { %1041 = vsyncpa [#allocation3 + $0x1], 1 }

</bundles_post_ra>
